<compile_context>
chip_gen: v7x
topology: tpu7x:2x2x1
jax: 0.10.0
libtpu: 0.0.40
codegen_flags: <defaults>
</compile_context>

<pallas_src>
import functools

import jax
import jax.numpy as jnp
from jax import lax
from jax.experimental import pallas as pl
from jax.experimental.pallas import tpu as pltpu


def _round_up(a: int, b: int) -> int:
    return (a + b - 1) // b * b


def _vq_kernel(z_ref, cb_ref, out_ref, idx_ref, loss_ref, *,
               num_codes, total_m, tile_m):
    """One M-tile of vector quantization.

    z_ref   : (TILE_M, D)            f32  latent tokens
    cb_ref  : (Kpad, D)              f32  codebook (rows >= num_codes are zero pad)
    out_ref : (TILE_M, D)            f32  quantized tokens (straight-through fwd)
    idx_ref : (1, TILE_M//128, 128)  i32  nearest-code indices, lane-dense
    loss_ref: (1, 8, 128)            f32  per-tile sum of (q - z)^2 (broadcast)
    """
    z = z_ref[...]
    cb = cb_ref[...]
    kpad = cb.shape[0]
    sub = tile_m // 128

    # Squared-distance matrix via one MXU matmul (f32 accumulate).
    dots = lax.dot_general(z, cb, (((1,), (1,)), ((), ())),
                           preferred_element_type=jnp.float32)      # (TILE_M, Kpad)
    z_sq = jnp.sum(z * z, axis=-1, keepdims=True)                   # (TILE_M, 1)
    cb_sq = jnp.sum(cb * cb, axis=-1).reshape(1, kpad)              # (1, Kpad)
    dist = z_sq - 2.0 * dots + cb_sq

    col = lax.broadcasted_iota(jnp.int32, (tile_m, kpad), 1)
    if num_codes != kpad:                                           # mask padded codes
        dist = jnp.where(col < num_codes, dist, jnp.float32(1e30))

    # First-occurrence argmin along the (lane) code axis.
    # Note: if a row is all-NaN the sentinel index kpad survives (out of range),
    # matching the previous version's behavior; harmless for the one-hot gather.
    min_val = jnp.min(dist, axis=-1, keepdims=True)                 # (TILE_M, 1)
    idx_col = jnp.where(dist == min_val, col, kpad)                 # (TILE_M, Kpad)
    idx2 = jnp.min(idx_col, axis=-1, keepdims=True)                 # (TILE_M, 1)

    # Gather codebook rows as a one-hot matmul (MXU friendly, exact in f32).
    onehot = (col == idx2).astype(jnp.float32)                      # (TILE_M, Kpad)
    q = jnp.dot(onehot, cb, preferred_element_type=jnp.float32)     # (TILE_M, D)
    out_ref[...] = q.astype(out_ref.dtype)

    # Lane-dense index output: split the token (sublane) axis into (sub, 128)
    # *before* the lane reduction so 128 token indices land per vreg row.
    idx3 = jnp.min(idx_col.reshape(sub, 128, kpad), axis=-1)        # (sub, 128) i32
    idx_ref[...] = idx3[None]

    # Per-tile partial loss sum (masked only when M was padded up to the grid).
    dsq = (q - z) * (q - z)
    if total_m % tile_m != 0:
        row = (lax.broadcasted_iota(jnp.int32, (tile_m, 1), 0)
               + pl.program_id(0) * tile_m)
        dsq = jnp.where(row < total_m, dsq, 0.0)
    loss_ref[...] = jnp.full((1, 8, 128), jnp.sum(dsq), jnp.float32)


def codebook_forward(x_nchw, embedding, *, block_m=1024):
    """Forward pass of the PyTorch Codebook module. Returns (out, indices, loss)."""
    B, D, H, W = x_nchw.shape
    K, D2 = embedding.shape
    assert D == D2, "channel dim of x must equal embedding_dim"
    assert block_m % 128 == 0

    M = B * H * W
    z = jnp.transpose(x_nchw, (0, 2, 3, 1)).reshape(M, D).astype(jnp.float32)

    tile_m = min(block_m, _round_up(M, 128))
    m_pad = _round_up(M, tile_m)
    num_tiles = m_pad // tile_m
    sub = tile_m // 128
    k_pad = _round_up(K, 128)

    z_p = z if m_pad == M else jnp.pad(z, ((0, m_pad - M), (0, 0)))
    cb = embedding.astype(jnp.float32)
    cb_p = cb if k_pad == K else jnp.pad(cb, ((0, k_pad - K), (0, 0)))

    kernel = functools.partial(_vq_kernel, num_codes=K, total_m=M, tile_m=tile_m)

    flops = 4 * m_pad * k_pad * D                      # two (tile_m x kpad x D) matmuls
    bytes_accessed = (2 * m_pad * D + k_pad * D + m_pad) * 4

    q_p, idx3, loss_part = pl.pallas_call(
        kernel,
        grid=(num_tiles,),
        in_specs=[
            pl.BlockSpec((tile_m, D), lambda i: (i, 0)),   # z tile, pipelined
            pl.BlockSpec((k_pad, D), lambda i: (0, 0)),    # codebook, VMEM-resident
        ],
        out_specs=(
            pl.BlockSpec((tile_m, D), lambda i: (i, 0)),
            pl.BlockSpec((1, sub, 128), lambda i: (i, 0, 0)),
            pl.BlockSpec((1, 8, 128), lambda i: (i, 0, 0)),
        ),
        out_shape=(
            jax.ShapeDtypeStruct((m_pad, D), jnp.float32),
            jax.ShapeDtypeStruct((num_tiles, sub, 128), jnp.int32),
            jax.ShapeDtypeStruct((num_tiles, 8, 128), jnp.float32),
        ),
        compiler_params=pltpu.CompilerParams(
            dimension_semantics=("parallel",),
            vmem_limit_bytes=48 * 1024 * 1024,             # sized for v7x's 64 MiB VMEM
        ),
        cost_estimate=pl.CostEstimate(
            flops=flops, transcendentals=0, bytes_accessed=bytes_accessed),
    )(z_p, cb_p)

    q = q_p[:M]
    indices = idx3.reshape(m_pad)[:M]
    loss = 2.0 * jnp.sum(loss_part[:, 0, 0]) / (M * D)

    # Straight-through estimator: out = z + sg(q - z) == q numerically in fwd.
    # TODO(synk): training needs jax.custom_vjp for the STE / commitment-loss grads.
    out = jnp.transpose(q.reshape(B, H, W, D), (0, 3, 1, 2))
    return out, indices, loss


def codebook_reference(x_nchw, embedding):
    """Pure-JAX reference of the PyTorch module's forward values."""
    B, D, H, W = x_nchw.shape
    z = jnp.transpose(x_nchw, (0, 2, 3, 1)).reshape(-1, D)
    d = (jnp.sum(z * z, axis=1, keepdims=True)
         + jnp.sum(embedding * embedding, axis=1)[None, :]
         - 2.0 * z @ embedding.T)
    idx = jnp.argmin(d, axis=1).astype(jnp.int32)
    q = embedding[idx]
    loss = 2.0 * jnp.mean((q - z) ** 2)
    out = jnp.transpose(q.reshape(B, H, W, D), (0, 3, 1, 2))
    return out, idx, loss


if __name__ == "__main__":
    key = jax.random.PRNGKey(0)
    kx, ke = jax.random.split(key)

    B, D, H, W = 2, 32, 16, 16          # embedding_dim = 32 (channel dim of x)
    K = 64                              # num_embeddings
    x = jax.random.normal(kx, (B, D, H, W), jnp.float32)
    emb = jax.random.uniform(ke, (K, D), jnp.float32,
                             minval=-1.0 / K, maxval=1.0 / K)

    # block_m=256 -> 2 grid tiles at this size, exercising the tiled/parallel path.
    fwd = jax.jit(functools.partial(codebook_forward, block_m=256))
    out, indices, loss = fwd(x, emb)
    jax.block_until_ready((out, indices, loss))

    ref_out, ref_idx, ref_loss = codebook_reference(x, emb)

    assert out.shape == (B, D, H, W) and out.dtype == jnp.float32
    assert indices.shape == (B * H * W,) and indices.dtype == jnp.int32
    assert loss.shape == () and loss.dtype == jnp.float32
    assert float(jnp.mean((indices == ref_idx).astype(jnp.float32))) > 0.99
    assert abs(float(loss) - float(ref_loss)) < 1e-4
    assert float(jnp.mean(jnp.abs(out - ref_out))) < 1e-3
    print("KERNEL_OK")
</pallas_src>

<mosaic_0001>
module attributes {stable_mosaic.version = 11 : i64} {
  func.func @_vq_kernel(%arg0: i32, %arg1: memref<256x32xf32, #tpu.memory_space<vmem>>, %arg2: memref<128x32xf32, #tpu.memory_space<vmem>>, %arg3: memref<256x32xf32, #tpu.memory_space<vmem>>, %arg4: memref<1x2x128xi32, #tpu.memory_space<vmem>>, %arg5: memref<1x8x128xf32, #tpu.memory_space<vmem>>) attributes {dimension_semantics = [#tpu.dimension_semantics<parallel>], iteration_bounds = array<i64: 2>, scalar_prefetch = 0 : i64, scratch_operands = 0 : i64, tpu.core_type = #tpu.core_type<tc>, window_params = [{transform_indices = @transform_0, window_bounds = array<i64: 256, 32>}, {pipeline_mode = #tpu.pipeline_mode<synchronous>, transform_indices = @transform_1, window_bounds = array<i64: 128, 32>}, {transform_indices = @transform_2, window_bounds = array<i64: 256, 32>}, {transform_indices = @transform_3, window_bounds = array<i64: 1, 2, 128>}, {transform_indices = @transform_4, window_bounds = array<i64: 1, 8, 128>}]} {
    %c0 = arith.constant 0 : index
    %c0_0 = arith.constant 0 : index
    %0 = vector.load %arg1[%c0, %c0_0] : memref<256x32xf32, #tpu.memory_space<vmem>>, vector<256x32xf32>
    %c0_1 = arith.constant 0 : index
    %c0_2 = arith.constant 0 : index
    %1 = vector.load %arg2[%c0_1, %c0_2] : memref<128x32xf32, #tpu.memory_space<vmem>>, vector<128x32xf32>
    %cst = arith.constant dense<0.000000e+00> : vector<256x128xf32>
    %2 = tpu.matmul %0, %1, %cst {dimension_numbers = #tpu.dot_dimension_numbers<[1], [1], [0], [0], [0, 0, 1, 0], [], []>} : vector<256x32xf32>, vector<128x32xf32>, vector<256x128xf32> -> vector<256x128xf32>
    %3 = arith.mulf %0, %0 : vector<256x32xf32>
    %cst_3 = arith.constant dense<0.000000e+00> : vector<256xf32>
    %4 = vector.multi_reduction <add>, %3, %cst_3 [1] : vector<256x32xf32> to vector<256xf32>
    %5 = vector.shape_cast %4 : vector<256xf32> to vector<256x1xf32>
    %6 = arith.mulf %1, %1 : vector<128x32xf32>
    %cst_4 = arith.constant dense<0.000000e+00> : vector<128xf32>
    %7 = vector.multi_reduction <add>, %6, %cst_4 [1] : vector<128x32xf32> to vector<128xf32>
    %8 = vector.shape_cast %7 : vector<128xf32> to vector<1x128xf32>
    %cst_5 = arith.constant 2.000000e+00 : f32
    %9 = vector.broadcast %cst_5 : f32 to vector<256x128xf32>
    %10 = arith.mulf %9, %2 : vector<256x128xf32>
    %11 = vector.broadcast %5 : vector<256x1xf32> to vector<256x128xf32>
    %12 = arith.subf %11, %10 : vector<256x128xf32>
    %13 = vector.broadcast %8 : vector<1x128xf32> to vector<256x128xf32>
    %14 = arith.addf %12, %13 : vector<256x128xf32>
    %15 = tpu.iota {dimensions = array<i32: 1>} : vector<256x128xi32>
    %c64_i32 = arith.constant 64 : i32
    %16 = vector.broadcast %c64_i32 : i32 to vector<256x128xi32>
    %17 = arith.cmpi slt, %15, %16 : vector<256x128xi32>
    %cst_6 = arith.constant 1.000000e+30 : f32
    %18 = vector.broadcast %cst_6 : f32 to vector<256x128xf32>
    %19 = arith.select %17, %14, %18 : vector<256x128xi1>, vector<256x128xf32>
    %cst_7 = arith.constant dense<0x7F800000> : vector<256xf32>
    %20 = vector.multi_reduction <minimumf>, %19, %cst_7 [1] : vector<256x128xf32> to vector<256xf32>
    %21 = vector.shape_cast %20 : vector<256xf32> to vector<256x1xf32>
    %22 = vector.broadcast %21 : vector<256x1xf32> to vector<256x128xf32>
    %23 = arith.cmpf oeq, %19, %22 : vector<256x128xf32>
    %c128_i32 = arith.constant 128 : i32
    %24 = vector.broadcast %c128_i32 : i32 to vector<256x128xi32>
    %25 = arith.select %23, %15, %24 : vector<256x128xi1>, vector<256x128xi32>
    %cst_8 = arith.constant dense<2147483647> : vector<256xi32>
    %26 = vector.multi_reduction <minsi>, %25, %cst_8 [1] : vector<256x128xi32> to vector<256xi32>
    %27 = vector.shape_cast %26 : vector<256xi32> to vector<256x1xi32>
    %28 = vector.broadcast %27 : vector<256x1xi32> to vector<256x128xi32>
    %29 = arith.cmpi eq, %15, %28 : vector<256x128xi32>
    %30 = arith.extui %29 : vector<256x128xi1> to vector<256x128xi32>
    %31 = arith.sitofp %30 : vector<256x128xi32> to vector<256x128xf32>
    %cst_9 = arith.constant dense<0.000000e+00> : vector<256x32xf32>
    %32 = tpu.matmul %31, %1, %cst_9 {dimension_numbers = #tpu.dot_dimension_numbers<[1], [0], [0], [1], [0, 0, 1, 1], [], []>} : vector<256x128xf32>, vector<128x32xf32>, vector<256x32xf32> -> vector<256x32xf32>
    %c0_10 = arith.constant 0 : index
    %c0_11 = arith.constant 0 : index
    %33 = vector.load %arg3[%c0_10, %c0_11] : memref<256x32xf32, #tpu.memory_space<vmem>>, vector<256x32xf32>
    tpu.vector_store %arg3[%c0_10, %c0_11], %32 {strides = array<i32>} : memref<256x32xf32, #tpu.memory_space<vmem>>, vector<256x32xf32>,
    %34 = vector.shape_cast %25 : vector<256x128xi32> to vector<2x128x128xi32>
    %cst_12 = arith.constant dense<2147483647> : vector<2x128xi32>
    %35 = vector.multi_reduction <minsi>, %34, %cst_12 [2] : vector<2x128x128xi32> to vector<2x128xi32>
    %36 = vector.shape_cast %35 : vector<2x128xi32> to vector<1x2x128xi32>
    %c0_13 = arith.constant 0 : index
    %c0_14 = arith.constant 0 : index
    %c0_15 = arith.constant 0 : index
    %37 = vector.load %arg4[%c0_13, %c0_14, %c0_15] : memref<1x2x128xi32, #tpu.memory_space<vmem>>, vector<1x2x128xi32>
    tpu.vector_store %arg4[%c0_13, %c0_14, %c0_15], %36 {strides = array<i32>} : memref<1x2x128xi32, #tpu.memory_space<vmem>>, vector<1x2x128xi32>,
    %38 = arith.subf %32, %0 : vector<256x32xf32>
    %39 = arith.subf %32, %0 : vector<256x32xf32>
    %40 = arith.mulf %38, %39 : vector<256x32xf32>
    %41 = vector.shape_cast %40 : vector<256x32xf32> to vector<1x256x32xf32>
    %cst_16 = arith.constant dense<0.000000e+00> : vector<1xf32>
    %42 = vector.multi_reduction <add>, %41, %cst_16 [1, 2] : vector<1x256x32xf32> to vector<1xf32>
    %43 = vector.shape_cast %42 : vector<1xf32> to vector<1x1x1xf32>
    %44 = vector.extract %43[0, 0, 0] : f32 from vector<1x1x1xf32>
    %45 = vector.broadcast %44 : f32 to vector<1x8x128xf32>
    %c0_17 = arith.constant 0 : index
    %c0_18 = arith.constant 0 : index
    %c0_19 = arith.constant 0 : index
    %46 = vector.load %arg5[%c0_17, %c0_18, %c0_19] : memref<1x8x128xf32, #tpu.memory_space<vmem>>, vector<1x8x128xf32>
    tpu.vector_store %arg5[%c0_17, %c0_18, %c0_19], %45 {strides = array<i32>} : memref<1x8x128xf32, #tpu.memory_space<vmem>>, vector<1x8x128xf32>,
    return
  }
  func.func @transform_0(%arg0: i32) -> (i32, i32) {
    %c0_i32 = arith.constant 0 : i32
    %c0_i32_0 = arith.constant 0 : i32
    return %arg0, %c0_i32 : i32, i32
  }
  func.func @transform_1(%arg0: i32) -> (i32, i32) {
    %c0_i32 = arith.constant 0 : i32
    %c0_i32_0 = arith.constant 0 : i32
    %c0_i32_1 = arith.constant 0 : i32
    return %c0_i32, %c0_i32_0 : i32, i32
  }
  func.func @transform_2(%arg0: i32) -> (i32, i32) {
    %c0_i32 = arith.constant 0 : i32
    %c0_i32_0 = arith.constant 0 : i32
    return %arg0, %c0_i32 : i32, i32
  }
  func.func @transform_3(%arg0: i32) -> (i32, i32, i32) {
    %c0_i32 = arith.constant 0 : i32
    %c0_i32_0 = arith.constant 0 : i32
    %c0_i32_1 = arith.constant 0 : i32
    return %arg0, %c0_i32, %c0_i32_0 : i32, i32, i32
  }
  func.func @transform_4(%arg0: i32) -> (i32, i32, i32) {
    %c0_i32 = arith.constant 0 : i32
    %c0_i32_0 = arith.constant 0 : i32
    %c0_i32_1 = arith.constant 0 : i32
    return %arg0, %c0_i32, %c0_i32_0 : i32, i32, i32
  }
}

</mosaic_0001>

<bundles_post_ra>
// kernel: codebook_forward.1
= control target key start
LH: loop header
LB: loop body
LE: loop exit
PB: predicated region body
PF: predicated region fallthrough
CT: control target
= control target key end

     0   :  { %10 = vsyncpa [#allocation3], 0  ;;  %s4833_s0 = inlined_call_operand.hbm [shape: f32[512,32], index: 0, kind: input, shape index: {}]   ;;  %s4834_s1 = inlined_call_operand.vmem [shape: f32[128,32], index: 1, kind: input, shape index: {}]   ;;  %s4835_s2 = inlined_call_operand.hbm [shape: f32[512,32], index: 2, kind: output, shape index: {0}]   ;;  %s4836_s3 = inlined_call_operand.hbm [shape: s32[2,2,128], index: 3, kind: output, shape index: {1}]   ;;  %s4837_s4 = inlined_call_operand.vmem [shape: f32[2,8,128], index: 4, kind: output, shape index: {2}]  }
   0x1   :  { %12 = vsyncpa [#allocation3 + $0x1], 0 }
   0x2   :  { %13 = vsyncpa [#allocation4], 0 }
   0x3   :  { %15 = vsyncpa [#allocation4 + $0x1], 0 }
   0x4   :  { %16 = vsyncpa [#allocation7], 0 }
   0x5   :  { %18 = vsyncpa [#allocation7 + $0x1], 0  ;;  %s3235_s15 = smov 0   ;;  %s3237_s16 = smov 0  }
   0x6   :  { %s3239_s17 = smov 0   ;;  %s3241_s18 = smov 0  }
   0x7 LB: > { %s3256_s19 = sadd.s32 4294967295, %s3200_s18   ;;  %s2514_s20 = sadd.s32 4294967294, %s3200_s18   ;;  %s3200_s18 = sphi %s3241_s18, %s5018_s18   ;;  %s3196_s17 = sphi %s3239_s17, %s5017_s17   ;;  %s3192_s16 = sphi %s3237_s16, %s5016_s16   ;;  %s3188_s15 = sphi %s3235_s15, %s5015_s15  }
   0x8   : > { %s3260_s21 = sadd.s32 1, %s3200_s18   ;;  %s31_s22 = sadd.s32 1, %s3196_s17 }
   0x9   : > { %s28_s23 = ssub.s32 %s3200_s18, %s3260_s21  ;;  %p38_p0 = scmp.ne.s32.totalorder %s3196_s17, %s3192_s16 }
   0xa   : > { %p29_p1 = scmp.eq.s32.totalorder %s28_s23, 0  ;;  %p39_p2 = scmp.eq.s32.totalorder %s3200_s18, 0 }
   0xb   : > { %p44_p3 = scmp.ne.s32.totalorder %s3192_s16, %s3188_s15  ;;  %p45_p4 = scmp.eq.s32.totalorder %s3256_s19, 0 }
   0xc   : > { %s3272_s24 = scalar_select %p29_p1, %s3196_s17, %s31_s22  }
   0xd   : > { %p3274_p5 = por %p39_p2, %p38_p0  ;;  %p3278_p6 = por %p45_p4, %p44_p3 }
   0xe   : > { %p89_p7 = scmp.eq.s32.totalorder %s3256_s19, 1  ;;  %p95_p8 = scmp.eq.s32.totalorder %s2514_s20, 1 }
   0xf   : > { %p3001_p10 = scmp.lt.s32.totalorder %s3200_s18, 2  ;;  %s170_s29 = sand.u32 1, %s3196_s17  }
  0x10   : > { %p3285_p11 = por %p89_p7, %p38_p0  ;;  %p3289_p12 = por %p95_p8, %p44_p3 }
  0x11   : > { %s2644_s30 = sshll.u32 %s3200_s18, 12  ;;  %s2517_s5 = sshll.u32 %s170_s29, 8 }
  0x12   : > { %s4888_s27 = scalar_select %p3285_p11, 1, 0 }
  0x13   : > { %s4889_s28 = scalar_select %p3289_p12, 1, 0 }
  0x14   : > { %s3298_s8 = scalar_lea.hbm %s4833_s0, %s2644_s30  ;;  %s174_s9 = scalar_lea.vmem [#allocation2], %s2517_s5 }
  0x15   : > { %s181_s10 = sshll.u32 %s174_s9, 4  ;;  %p3302_p13 = pnand %p3001_p10, %p3274_p5  ;;  %s3306_s10 = int_to_ptr.vmem [resolvable:$true] %s181_s10 }
  0x16   : > { %s3308_s12 = scalar_lea.sflag [#allocation3], %s170_s29  ;;  %s3072_s13 = scalar_lea.hbm %s3298_s8, 4096 }
  0x17   : > { %p3073_p0 = scmp.ne.s32.totalorder %s3298_s8, %s3072_s13  ;;  %p3074_p1 = pneg %p3302_p13 }
  0x18   : > { %s3077_s22 = scalar_lea.hbm %s4833_s0, 8192  ;;  %p3078_p4 = scmp.lt.u32.totalorder %s3298_s8, %s4833_s0 }
  0x19   : > { %p3075_p2 = pnand %p3074_p1, %p3073_p0  ;;  %p3079_p5 = scmp.lt.u32.totalorder %s3077_s22, %s3072_s13 }
  0x1a   : > { %p3081_p8 = scmp.lt.u32.totalorder %s3072_s13, %s3298_s8 }
  0x1b   : > { %p3076_p3 = pneg %p3075_p2  ;;  %p3080_p7 = por %p3079_p5, %p3078_p4 }
  0x1d   : > { %p3082_p10 = por %p3081_p8, %p3080_p7 }
  0x1f   : > { %p3083_p9 = pnand %p3082_p10, %p3076_p3 }
  0x21   : > { %3086 = shalt.err (!%p3083_p9)
}
  0x22   : > { %s3087_s29 = scalar_lea.vmem %s3306_s10, 4096  ;;  %s3202_s30 = smov [#allocation2]  }
  0x23   : > { %p3088_p0 = scmp.ne.s32.totalorder %s3306_s10, %s3087_s29  ;;  %s3092_s5 = sshll.u32 %s3202_s30, 4  ;;  %s3093_s5 = int_to_ptr.vmem [resolvable:$false] %s3092_s5 }
  0x24   : > { %s3094_s6 = scalar_lea.vmem %s3093_s5, 8192  ;;  %p3095_p11 = scmp.lt.s32.totalorder %s3306_s10, %s3093_s5 }
  0x25   : > { %p3090_p2 = pnand %p3088_p0, %p3074_p1  ;;  %p3096_p4 = scmp.lt.s32.totalorder %s3094_s6, %s3087_s29 }
  0x27   : > { %p3091_p12 = pneg %p3090_p2  ;;  %p3097_p5 = por %p3096_p4, %p3095_p11 }
  0x29   : > { %p3098_p7 = pnand %p3097_p5, %p3091_p12 }
  0x2b   : > { %3101 = shalt.err (!%p3098_p7)
}
  0x2c   : > { %s3203_s7 = smov 128   ;;  %s3204_s9 = smov 8  }
  0x2d   : > { %2993 = dma.hbm_to_vmem [thread:$0]  (!%p3302_p13), %s3298_s8, 4096, %s3306_s10, %s3308_s12, %s3203_s7, %s3203_s7, %s3204_s9  }
  0x2e   : > { %p2520_p9 = scmp.ge.s32.totalorder %s3200_s18, 1  ;;  %p189_p1 = scmp.lt.s32.totalorder %s3200_s18, 3 }
  0x30   : > { %p190_p3 = pnand %p2520_p9, %p189_p1 }
  0x32   : > { %193 = sbr.rel (%p190_p3) target bundleno = 1276 (0x4fc), region = 28 }
  0x39   : > { %s3339_s13 = sand.u32 1, %s3192_s16  }
  0x3a   : > { %s2521_s14 = sshll.u32 %s3339_s13, 8  ;;  %s196_s20 = scalar_lea.sflag [#allocation3], %s3339_s13 }
  0x3b   : > { %s3345_s22 = scalar_lea.vmem [#allocation2], %s2521_s14 }
  0x3c   : > { %3175 = dma.done.wait (%p3278_p6), %s196_s20, 4096  }
  0x3d   : > { %3177 = vsyncadd (%p3278_p6), %s196_s20, 4294963200  ;;  %vm4839_vm0 = vcmask 261120   ;;  %v271_v1 = vld [vmem:[%s4834_s1] sm:$0xff]  ;;  %v272_v2 = vld [vmem:[%s4834_s1 + $0x8] sm:$0xff]  ;;  %vm940_vm2 = vcmask 130112   ;;  %vm947_vm3 = vcmask 195712  }
  0x3e   : > { %vm3353_vm1 = vmpackc.low %vm4839_vm0, %vm4839_vm0  ;;  %v273_v3 = vld [vmem:[%s4834_s1 + $0x10] sm:$0xff]  ;;  %v2902_v4 = vpack.c.bf16 %v272_v2, %v271_v1  ;;  %v274_v5 = vld [vmem:[%s4834_s1 + $0x18] sm:$0xff]  ;;  %v785_v6 = vmul.f32 %v271_v1, %v271_v1  ;;  %v786_v8 = vmul.f32 %v272_v2, %v272_v2  ;;  %vm954_vm4 = vcmask 261312   ;;  %s2523_s23 = sshll.u32 %s3339_s13, 1  ;;  %s4622_s26 = scalar_lea.vmem [#allocation5], %s2521_s14 }
  0x3f   : > { %v787_v7 = vmul.f32 %v273_v3, %v273_v3  ;;  %v2908_v9 = vpack.c.bf16 %v274_v5, %v273_v3  ;;  %v788_v10 = vmul.f32 %v274_v5, %v274_v5  ;;  %v275_v13 = vld [vmem:[%s4834_s1 + $0x20] sm:$0xff]  ;;  %v276_v14 = vld [vmem:[%s4834_s1 + $0x28] sm:$0xff]  ;;  %v277_v20 = vld [vmem:[%s4834_s1 + $0x30] sm:$0xff]  ;;  %vm961_vm5 = vcmask 326912   ;;  %s4617_s25 = scalar_lea.vmem [#allocation6], %s2523_s23  ;;  %s2645_s14 = sshll.u32 %s3256_s19, 12 }
  0x40   : > { %2904 = vmatprep.subr.msk.bf16.mxu0 %vm3353_vm1, %v2902_v4  ;;  %v801_v11 = vsel %vm4839_vm0, %v785_v6, 0.0  ;;  %2951 = vmatprep.subr.bf16.mxu1 %v2902_v4  ;;  %v3384_v15 = vld [vmem:[%s3345_s22] sm:$0xff]  ;;  %v804_v16 = vsel %vm4839_vm0, %v786_v8, 0.0  ;;  %v789_v17 = vmul.f32 %v275_v13, %v275_v13  ;;  %v790_v19 = vmul.f32 %v276_v14, %v276_v14  ;;  %v278_v22 = vld [vmem:[%s4834_s1 + $0x38] sm:$0xff]  ;;  %v280_v28 = vld [vmem:[%s4834_s1 + $0x48] sm:$0xff]  ;;  %s2369_s29 = sshll.u32 %s4622_s26, 4  ;;  %s4757_s5 = scalar_lea.hbm %s4835_s2, %s2645_s14  ;;  %s4759_s29 = int_to_ptr.vmem [resolvable:$true] %s2369_s29 }
  0x41   : > { %v807_v12 = vsel %vm4839_vm0, %v787_v7, 0.0  ;;  %2907 = vmatpush3.bf16.xpose.msk.msra.mxu0 %vm3353_vm1, %v2902_v4  ;;  %802 = vadd.xlane.f32.xlu0 %v801_v11  ;;  %v810_v18 = vsel %vm4839_vm0, %v788_v10, 0.0  ;;  %v2914_v21 = vpack.c.bf16 %v276_v14, %v275_v13  ;;  %v791_v24 = vmul.f32 %v277_v20, %v277_v20  ;;  %v279_v27 = vld [vmem:[%s4834_s1 + $0x40] sm:$0xff]  ;;  %v281_v34 = vld [vmem:[%s4834_s1 + $0x50] sm:$0xff]  ;;  %v282_v35 = vld [vmem:[%s4834_s1 + $0x58] sm:$0xff]  ;;  %s2347_s6 = scalar_lea.sflag [#allocation4], %s3339_s13 }
  0x42   : > { %2910 = vmatprep.subr.msk.bf16.mxu0 %vm3353_vm1, %v2908_v9  ;;  %808 = vadd.xlane.f32.xlu1 %v807_v12  ;;  %v813_v23 = vsel %vm4839_vm0, %v789_v17, 0.0  ;;  %v816_v25 = vsel %vm4839_vm0, %v790_v19, 0.0  ;;  %v792_v26 = vmul.f32 %v278_v22, %v278_v22  ;;  %v793_v30 = vmul.f32 %v279_v27, %v279_v27  ;;  %v283_v41 = vld [vmem:[%s4834_s1 + $0x60] sm:$0xff]  ;;  %v284_v42 = vld [vmem:[%s4834_s1 + $0x68] sm:$0xff]  ;;  %v285_v48 = vld [vmem:[%s4834_s1 + $0x70] sm:$0xff]  ;;  %s3102_s7 = scalar_lea.vmem %s4759_s29, 4096 }
  0x43   : > { %2774 = vmatprep.mubr.msk.f32.mxu0 %vm4839_vm0, %v3384_v15  ;;  %2953 = vmatpush3.bf16.msra.mxu1 %v2902_v4  ;;  %v819_v29 = vsel %vm4839_vm0, %v791_v24, 0.0  ;;  %v2920_v31 = vpack.c.bf16 %v278_v22, %v277_v20  ;;  %v794_v33 = vmul.f32 %v280_v28, %v280_v28  ;;  %v795_v37 = vmul.f32 %v281_v34, %v281_v34  ;;  %v286_v49 = vld [vmem:[%s4834_s1 + $0x78] sm:$0xff]  ;;  %v3443_v55 = vld [vmem:[%s3345_s22 + $0x8] sm:$0xff]  ;;  %v3454_v61 = vld [vmem:[%s3345_s22 + $0x10] sm:$0xff]  ;;  %p3103_p6 = scmp.ne.s32.totalorder %s4759_s29, %s3102_s7  ;;  %p5012_p11 = scmp.ne.s32.totalorder %s4888_s27, 0 }
  0x44   : > { %2955 = vmatprep.subr.bf16.mxu1 %v2908_v9  ;;  %v822_v32 = vsel %vm4839_vm0, %v792_v26, 0.0  ;;  %v825_v36 = vsel %vm4839_vm0, %v793_v30, 0.0  ;;  %v796_v39 = vmul.f32 %v282_v35, %v282_v35  ;;  %v2926_v40 = vpack.c.bf16 %v280_v28, %v279_v27  ;;  %v3458_v62 = vld [vmem:[%s3345_s22 + $0x18] sm:$0xff]  ;;  %v3470_v4 = vld [vmem:[%s3345_s22 + $0x20] sm:$0xff]  ;;  %v3475_v5 = vld [vmem:[%s3345_s22 + $0x28] sm:$0xff]  ;;  %s3206_s9 = smov [#allocation5]  }
  0x45   : > { %805 = vadd.xlane.f32.xlu0 %v804_v16  ;;  %v828_v38 = vsel %vm4839_vm0, %v794_v33, 0.0  ;;  %v831_v43 = vsel %vm4839_vm0, %v795_v37, 0.0  ;;  %v797_v44 = vmul.f32 %v283_v41, %v283_v41  ;;  %v2932_v45 = vpack.c.bf16 %v282_v35, %v281_v34  ;;  %v3484_v10 = vld [vmem:[%s3345_s22 + $0x30] sm:$0xff]  ;;  %v3487_v11 = vld [vmem:[%s3345_s22 + $0x38] sm:$0xff]  ;;  %v3498_v16 = vld [vmem:[%s3345_s22 + $0x40] sm:$0xff]  ;;  %p3104_p12 = pnand %p3103_p6, %p5012_p11  ;;  %s3106_s20 = sshll.u32 %s3206_s9, 4  ;;  %s3107_s20 = int_to_ptr.vmem [resolvable:$false] %s3106_s20 }
  0x46   : > { %811 = vadd.xlane.f32.xlu1 %v810_v18  ;;  %v834_v46 = vsel %vm4839_vm0, %v796_v39, 0.0  ;;  %v798_v47 = vmul.f32 %v284_v42, %v284_v42  ;;  %v799_v51 = vmul.f32 %v285_v48, %v285_v48  ;;  %v800_v53 = vmul.f32 %v286_v49, %v286_v49  ;;  %v3503_v17 = vld [vmem:[%s3345_s22 + $0x48] sm:$0xff]  ;;  %v3512_v22 = vld [vmem:[%s3345_s22 + $0x50] sm:$0xff]  ;;  %v3526_v28 = vld [vmem:[%s3345_s22 + $0x60] sm:$0xff]  ;;  %s3108_s8 = scalar_lea.vmem %s3107_s20, 8192  ;;  %p3109_p8 = scmp.lt.s32.totalorder %s4759_s29, %s3107_s20 }
  0x47   : > { %2957 = vmatpush3.bf16.msra.mxu1 %v2908_v9  ;;  %v837_v50 = vsel %vm4839_vm0, %v797_v44, 0.0  ;;  %v2938_v54 = vpack.c.bf16 %v284_v42, %v283_v41  ;;  %v657_v57 = vmul.f32 %v3384_v15, %v3384_v15  ;;  %v3448_v58 = vpack.c.bf16 %v286_v49, %v285_v48  ;;  %v3541_v34 = vld [vmem:[%s3345_s22 + $0x70] sm:$0xff]  ;;  %v3544_v35 = vld [vmem:[%s3345_s22 + $0x78] sm:$0xff]  ;;  %v3559_v41 = vld [vmem:[%s3345_s22 + $0x88] sm:$0xff]  ;;  %p3105_p13 = pneg %p3104_p12  ;;  %p3110_p10 = scmp.lt.s32.totalorder %s3108_s8, %s3102_s7 }
  0x48   : > { %2959 = vmatprep.subr.bf16.mxu1 %v2914_v21  ;;  %v840_v52 = vsel %vm4839_vm0, %v798_v47, 0.0  ;;  %v843_v56 = vsel %vm4839_vm0, %v799_v51, 0.0  ;;  %v846_v59 = vsel %vm4839_vm0, %v800_v53, 0.0  ;;  %v658_v60 = vmul.f32 %v3443_v55, %v3443_v55  ;;  %v3568_v0 = vld [vmem:[%s3345_s22 + $0x90] sm:$0xff]  ;;  %v3584_v51 = vld [vmem:[%s3345_s22 + $0xa0] sm:$0xff] }
  0x49   : > { %2913 = vmatpush3.bf16.xpose.msk.msra.mxu0 %vm3353_vm1, %v2908_v9  ;;  %814 = vadd.xlane.f32.xlu0 %v813_v23  ;;  %v689_v63 = vsel %vm4839_vm0, %v657_v57, 0.0  ;;  %v659_v1 = vmul.f32 %v3454_v61, %v3454_v61  ;;  %v660_v3 = vmul.f32 %v3458_v62, %v3458_v62  ;;  %v661_v7 = vmul.f32 %v3470_v4, %v3470_v4  ;;  %v3515_v23 = vld [vmem:[%s3345_s22 + $0x58] sm:$0xff]  ;;  %v3600_v57 = vld [vmem:[%s3345_s22 + $0xb0] sm:$0xff]  ;;  %p3111_p0 = por %p3110_p10, %p3109_p8 }
  0x4a   : > { %2916 = vmatprep.subr.msk.bf16.mxu0 %vm3353_vm1, %v2914_v21  ;;  %817 = vadd.xlane.f32.xlu1 %v816_v25  ;;  %v692_v2 = vsel %vm4839_vm0, %v658_v60, 0.0  ;;  %v662_v9 = vmul.f32 %v3475_v5, %v3475_v5  ;;  %v663_v13 = vmul.f32 %v3484_v10, %v3484_v10  ;;  %v664_v15 = vmul.f32 %v3487_v11, %v3487_v11 }
  0x4b   : > { %2961 = vmatpush3.bf16.msra.mxu1 %v2914_v21  ;;  %v695_v6 = vsel %vm4839_vm0, %v659_v1, 0.0  ;;  %v698_v8 = vsel %vm4839_vm0, %v660_v3, 0.0  ;;  %v701_v12 = vsel %vm4839_vm0, %v661_v7, 0.0  ;;  %v665_v19 = vmul.f32 %v3498_v16, %v3498_v16  ;;  %v264_v1 = vld [vmem:[%s3345_s22 + $0xc8] sm:$0xff]  ;;  %v266_v7 = vld [vmem:[%s3345_s22 + $0xd8] sm:$0xff]  ;;  %p3112_p2 = pnand %p3111_p0, %p3105_p13 }
  0x4c   : > { %2963 = vmatprep.subr.bf16.mxu1 %v2920_v31  ;;  %v704_v14 = vsel %vm4839_vm0, %v662_v9, 0.0  ;;  %v707_v18 = vsel %vm4839_vm0, %v663_v13, 0.0  ;;  %v710_v20 = vsel %vm4839_vm0, %v664_v15, 0.0  ;;  %v667_v25 = vmul.f32 %v3512_v22, %v3512_v22  ;;  %v268_v13 = vld [vmem:[%s3345_s22 + $0xe8] sm:$0xff] }
  0x4d   : > { %820 = vadd.xlane.f32.xlu0 %v819_v29  ;;  %v713_v24 = vsel %vm4839_vm0, %v665_v19, 0.0  ;;  %v668_v27 = vmul.f32 %v3515_v23, %v3515_v23  ;;  %v3532_v29 = vld [vmem:[%s3345_s22 + $0x68] sm:$0xff]  ;;  %v671_v37 = vmul.f32 %v3541_v34, %v3541_v34  ;;  %v672_v39 = vmul.f32 %v3544_v35, %v3544_v35  ;;  %v270_v19 = vld [vmem:[%s3345_s22 + $0xf8] sm:$0xff] }
  0x4e   : > { %823 = vadd.xlane.f32.xlu1 %v822_v32  ;;  %v719_v30 = vsel %vm4839_vm0, %v667_v25, 0.0  ;;  %v670_v33 = vmul.f32 %v3532_v29, %v3532_v29  ;;  %v675_v48 = vmul.f32 %v3568_v0, %v3568_v0  ;;  %v679_v60 = vmul.f32 %v3600_v57, %v3600_v57 }
  0x4f   : > { %2965 = vmatpush3.bf16.msra.mxu1 %v2920_v31  ;;  %v722_v32 = vsel %vm4839_vm0, %v668_v27, 0.0  ;;  %v731_v42 = vsel %vm4839_vm0, %v671_v37, 0.0  ;;  %v734_v44 = vsel %vm4839_vm0, %v672_v39, 0.0  ;;  %vm968_vm6 = vcmask 392512  }
  0x50   : > { %2967 = vmatprep.subr.bf16.mxu1 %v2926_v40  ;;  %v743_v53 = vsel %vm4839_vm0, %v675_v48, 0.0  ;;  %vm975_vm7 = vcmask 458112   ;;  %vm982_vm8 = vcmask 523712   ;;  %vm989_vm9 = vcmask 589312  }
  0x51   : > { %2919 = vmatpush3.bf16.xpose.msk.msra.mxu0 %vm3353_vm1, %v2914_v21  ;;  %826 = vadd.xlane.f32.xlu0 %v825_v36  ;;  %v666_v21 = vmul.f32 %v3503_v17, %v3503_v17  ;;  %vm996_vm10 = vcmask 654912   ;;  %vm1003_vm11 = vcmask 720512   ;;  %vm1010_vm12 = vcmask 786112  }
  0x52   : > { %2922 = vmatprep.subr.msk.bf16.mxu0 %vm3353_vm1, %v2920_v31  ;;  %829 = vadd.xlane.f32.xlu1 %v828_v38  ;;  %v728_v38 = vsel %vm4839_vm0, %v670_v33, 0.0  ;;  %vm1017_vm13 = vcmask 851712   ;;  %vm4885_vm14 = vcmask 917312   ;;  %vm4841_vm15 = vcmask 982912  }
  0x53   : > { %2969 = vmatpush3.bf16.msra.mxu1 %v2926_v40  ;;  %v716_v26 = vsel %vm4839_vm0, %v666_v21, 0.0 }
  0x54   : > { %2971 = vmatprep.subr.bf16.mxu1 %v2932_v45 }
  0x55   : > { %832 = vadd.xlane.f32.xlu0 %v831_v43 }
  0x56   : > { %835 = vadd.xlane.f32.xlu1 %v834_v46  ;;  %v3571_v46 = vld [vmem:[%s3345_s22 + $0x98] sm:$0xff] }
  0x57   : > { %2973 = vmatpush3.bf16.msra.mxu1 %v2932_v45 }
  0x58   : > { %2975 = vmatprep.subr.bf16.mxu1 %v2938_v54 }
  0x59   : > { %2925 = vmatpush3.bf16.xpose.msk.msra.mxu0 %vm3353_vm1, %v2920_v31  ;;  %838 = vadd.xlane.f32.xlu0 %v837_v50  ;;  %v669_v31 = vmul.f32 %v3526_v28, %v3526_v28  ;;  %v676_v50 = vmul.f32 %v3571_v46, %v3571_v46 }
  0x5a   : > { %2928 = vmatprep.subr.msk.bf16.mxu0 %vm3353_vm1, %v2926_v40  ;;  %841 = vadd.xlane.f32.xlu1 %v840_v52  ;;  %v3587_v52 = vld [vmem:[%s3345_s22 + $0xa8] sm:$0xff] }
  0x5b   : > { %2977 = vmatpush3.bf16.msra.mxu1 %v2938_v54  ;;  %v725_v36 = vsel %vm4839_vm0, %v669_v31, 0.0 }
  0x5c   : > { %2979 = vmatprep.subr.bf16.mxu1 %v3448_v58 }
  0x5d   : > { %844 = vadd.xlane.f32.xlu0 %v843_v56  ;;  %v746_v56 = vsel %vm4839_vm0, %v676_v50, 0.0 }
  0x5e   : > { %847 = vadd.xlane.f32.xlu1 %v846_v59 }
  0x5f   : > { %2981 = vmatpush3.bf16.msra.mxu1 %v3448_v58 }
  0x61   : > { %2931 = vmatpush3.bf16.xpose.msk.msra.mxu0 %vm3353_vm1, %v2926_v40  ;;  %690 = vadd.xlane.f32.xlu0 %v689_v63  ;;  %v3556_v40 = vld [vmem:[%s3345_s22 + $0x80] sm:$0xff] }
  0x62   : > { %2934 = vmatprep.subr.msk.bf16.mxu0 %vm3353_vm1, %v2932_v45  ;;  %693 = vadd.xlane.f32.xlu1 %v692_v2  ;;  %v673_v43 = vmul.f32 %v3556_v40, %v3556_v40  ;;  %v755_v2 = vsel %vm4839_vm0, %v679_v60, 0.0 }
  0x64   : > { %v737_v47 = vsel %vm4839_vm0, %v673_v43, 0.0 }
  0x65   : > { %696 = vadd.xlane.f32.xlu0 %v695_v6  ;;  %v682_v6 = vmul.f32 %v264_v1, %v264_v1 }
  0x66   : > { %699 = vadd.xlane.f32.xlu1 %v698_v8 }
  0x69   : > { %2937 = vmatpush3.bf16.xpose.msk.msra.mxu0 %vm3353_vm1, %v2932_v45  ;;  %702 = vadd.xlane.f32.xlu0 %v701_v12  ;;  %v674_v45 = vmul.f32 %v3559_v41, %v3559_v41  ;;  %v684_v12 = vmul.f32 %v266_v7, %v266_v7 }
  0x6a   : > { %2940 = vmatprep.subr.msk.bf16.mxu0 %vm3353_vm1, %v2938_v54  ;;  %705 = vadd.xlane.f32.xlu1 %v704_v14 }
  0x6b   : > { %v740_v49 = vsel %vm4839_vm0, %v674_v45, 0.0 }
  0x6d   : > { %708 = vadd.xlane.f32.xlu0 %v707_v18  ;;  %v686_v18 = vmul.f32 %v268_v13, %v268_v13 }
  0x6e   : > { %711 = vadd.xlane.f32.xlu1 %v710_v20 }
  0x71   : > { %2943 = vmatpush3.bf16.xpose.msk.msra.mxu0 %vm3353_vm1, %v2938_v54  ;;  %714 = vadd.xlane.f32.xlu0 %v713_v24  ;;  %v677_v54 = vmul.f32 %v3584_v51, %v3584_v51  ;;  %v688_v24 = vmul.f32 %v270_v19, %v270_v19 }
  0x72   : > { %2946 = vmatprep.subr.msk.bf16.mxu0 %vm3353_vm1, %v3448_v58  ;;  %717 = vadd.xlane.f32.xlu1 %v716_v26 }
  0x73   : > { %v749_v59 = vsel %vm4839_vm0, %v677_v54, 0.0  ;;  %v782_v25 = vsel %vm4839_vm0, %v688_v24, 0.0 }
  0x75   : > { %720 = vadd.xlane.f32.xlu0 %v719_v30 }
  0x76   : > { %723 = vadd.xlane.f32.xlu1 %v722_v32  ;;  %v929_v32 = vlaneseq }
  0x79   : > { %2949 = vmatpush3.bf16.xpose.msk.msra.mxu0 %vm3353_vm1, %v3448_v58  ;;  %726 = vadd.xlane.f32.xlu0 %v725_v36  ;;  %v262_v58 = vld [vmem:[%s3345_s22 + $0xb8] sm:$0xff]  ;;  %vm4840_vm1 = vcmask 1048512  }
  0x7a   : > { %729 = vadd.xlane.f32.xlu1 %v728_v38  ;;  %v680_v63 = vmul.f32 %v262_v58, %v262_v58  ;;  %v3674_v38 = vshrl.u32 %v929_v32, 7 }
  0x7d   : > { %732 = vadd.xlane.f32.xlu0 %v731_v42 }
  0x7e   : > { %735 = vadd.xlane.f32.xlu1 %v734_v44 }
  0x80   : > { %2775 = vmatmul.mubr.msk.f32.vlgmr.msra.gmra.mrb[0].mxu0 %vm4839_vm0, %v3443_v55  ;;  %v678_v55 = vmul.f32 %v3587_v52, %v3587_v52 }
  0x81   : > { %2777 = vmatprep.mubr.msk.f32.mxu0 %vm4839_vm0, %v3454_v61  ;;  %738 = vadd.xlane.f32.xlu0 %v737_v47 }
  0x82   : > { %741 = vadd.xlane.f32.xlu1 %v740_v49  ;;  %v752_v61 = vsel %vm4839_vm0, %v678_v55, 0.0 }
  0x84   : > { %2778 = vmatmul.mubr.msk.f32.gmra.mrb[2].mxu0 %vm4839_vm0, %v3458_v62  ;;  %v263_v62 = vld [vmem:[%s3345_s22 + $0xc0] sm:$0xff] }
  0x85   : > { %2780 = vmatprep.mubr.msk.f32.mxu0 %vm4839_vm0, %v3470_v4  ;;  %744 = vadd.xlane.f32.xlu0 %v743_v53  ;;  %v681_v3 = vmul.f32 %v263_v62, %v263_v62  ;;  %v758_v4 = vsel %vm4839_vm0, %v680_v63, 0.0 }
  0x86   : > { %747 = vadd.xlane.f32.xlu1 %v746_v56 }
  0x87   : > { %v761_v8 = vsel %vm4839_vm0, %v681_v3, 0.0 }
  0x88   : > { %2781 = vmatmul.mubr.msk.f32.gmra.mrb[4].mxu0 %vm4839_vm0, %v3475_v5  ;;  %v265_v5 = vld [vmem:[%s3345_s22 + $0xd0] sm:$0xff] }
  0x89   : > { %2783 = vmatprep.mubr.msk.f32.mxu0 %vm4839_vm0, %v3484_v10  ;;  %750 = vadd.xlane.f32.xlu0 %v749_v59  ;;  %v683_v9 = vmul.f32 %v265_v5, %v265_v5  ;;  %v764_v10 = vsel %vm4839_vm0, %v682_v6, 0.0 }
  0x8a   : > { %753 = vadd.xlane.f32.xlu1 %v752_v61 }
  0x8b   : > { %v767_v14 = vsel %vm4839_vm0, %v683_v9, 0.0 }
  0x8c   : > { %2784 = vmatmul.mubr.msk.f32.gmra.mrb[6].mxu0 %vm4839_vm0, %v3487_v11  ;;  %v267_v11 = vld [vmem:[%s3345_s22 + $0xe0] sm:$0xff] }
  0x8d   : > { %2786 = vmatprep.mubr.msk.f32.mxu0 %vm4839_vm0, %v3498_v16  ;;  %756 = vadd.xlane.f32.xlu0 %v755_v2  ;;  %v685_v15 = vmul.f32 %v267_v11, %v267_v11  ;;  %v770_v16 = vsel %vm4839_vm0, %v684_v12, 0.0 }
  0x8e   : > { %759 = vadd.xlane.f32.xlu1 %v758_v4 }
  0x8f   : > { %v773_v20 = vsel %vm4839_vm0, %v685_v15, 0.0 }
  0x90   : > { %2787 = vmatmul.mubr.msk.f32.gmra.mrb[8].mxu0 %vm4839_vm0, %v3503_v17  ;;  %v269_v17 = vld [vmem:[%s3345_s22 + $0xf0] sm:$0xff] }
  0x91   : > { %2789 = vmatprep.mubr.msk.f32.mxu0 %vm4839_vm0, %v3512_v22  ;;  %762 = vadd.xlane.f32.xlu0 %v761_v8  ;;  %v687_v21 = vmul.f32 %v269_v17, %v269_v17  ;;  %v776_v22 = vsel %vm4839_vm0, %v686_v18, 0.0 }
  0x92   : > { %765 = vadd.xlane.f32.xlu1 %v764_v10 }
  0x94   : > { %2790 = vmatmul.mubr.msk.f32.gmra.mrb[10].mxu0 %vm4839_vm0, %v3515_v23  ;;  %v779_v23 = vsel %vm4839_vm0, %v687_v21, 0.0 }
  0x95   : > { %2792 = vmatprep.mubr.msk.f32.mxu0 %vm4839_vm0, %v3526_v28  ;;  %768 = vadd.xlane.f32.xlu0 %v767_v14 }
  0x96   : > { %771 = vadd.xlane.f32.xlu1 %v770_v16 }
  0x98   : > { %2793 = vmatmul.mubr.msk.f32.gmra.mrb[12].mxu0 %vm4839_vm0, %v3532_v29 }
  0x99   : > { %2795 = vmatprep.mubr.msk.f32.mxu0 %vm4839_vm0, %v3541_v34  ;;  %774 = vadd.xlane.f32.xlu0 %v773_v20 }
  0x9a   : > { %777 = vadd.xlane.f32.xlu1 %v776_v22 }
  0x9c   : > { %2796 = vmatmul.mubr.msk.f32.gmra.mrb[14].mxu0 %vm4839_vm0, %v3544_v35  ;;  %v3670_v35 = vand.u32 127, %v929_v32 }
  0x9d   : > { %2798 = vmatprep.mubr.msk.f32.mxu0 %vm4839_vm0, %v3556_v40  ;;  %780 = vadd.xlane.f32.xlu0 %v779_v23 }
  0x9e   : > { %783 = vadd.xlane.f32.xlu1 %v782_v25  ;;  %4893 = vst [vmem:[#allocation11_spill] sm:$0xff] %v3670_v35  ;;  %v935_v39 = vadd.s32 4294967288, %v3670_v35  ;;  %v942_v40 = vadd.s32 4294967280, %v3670_v35  ;;  %v949_v45 = vadd.s32 4294967272, %v3670_v35  ;;  %v956_v48 = vadd.s32 4294967264, %v3670_v35 }
  0x9f   : > { %v963_v54 = vadd.s32 4294967256, %v3670_v35  ;;  %v991_v12 = vadd.s32 4294967224, %v3670_v35  ;;  %v998_v16 = vadd.s32 4294967216, %v3670_v35  ;;  %v1005_v21 = vadd.s32 4294967208, %v3670_v35 }
  0xa0   : > { %2799 = vmatmul.mubr.msk.f32.gmra.mrb[16].mxu0 %vm4839_vm0, %v3559_v41  ;;  %v3680_v41 = vsub.s32 %v3670_v35, %v3674_v38  ;;  %v3683_v42 = vsub.s32 %v935_v39, %v3674_v38  ;;  %v3697_v49 = vsub.s32 %v949_v45, %v3674_v38  ;;  %v3707_v56 = vsub.s32 %v956_v48, %v3674_v38 }
  0xa1   : > { %2801 = vmatprep.mubr.msk.f32.mxu0 %vm4839_vm0, %v3568_v0  ;;  %v3691_v0 = vsub.s32 %v942_v40, %v3674_v38  ;;  %v3713_v59 = vsub.s32 %v963_v54, %v3674_v38  ;;  %v3755_v22 = vsub.s32 %v998_v16, %v3674_v38 }
  0xa2   : > { %4894 = vst [vmem:[#allocation12_spill] sm:$0xff] %v3680_v41  ;;  %4895 = vst [vmem:[#allocation13_spill] sm:$0xff] %v3683_v42 }
  0xa3   : > { %4896 = vst [vmem:[#allocation14_spill] sm:$0xff] %v3691_v0  ;;  %4897 = vst [vmem:[#allocation15_spill] sm:$0xff] %v3697_v49 }
  0xa4   : > { %2802 = vmatmul.mubr.msk.f32.gmra.mrb[18].mxu0 %vm4839_vm0, %v3571_v46  ;;  %4898 = vst [vmem:[#allocation16_spill] sm:$0xff] %v3707_v56  ;;  %4899 = vst [vmem:[#allocation17_spill] sm:$0xff] %v3713_v59 }
  0xa5   : > { %2804 = vmatprep.mubr.msk.f32.mxu0 %vm4839_vm0, %v3584_v51  ;;  %4904 = vst [vmem:[#allocation22_spill] sm:$0xff] %v3755_v22 }
  0xa8   : > { %2805 = vmatmul.mubr.msk.f32.gmra.mrb[20].mxu0 %vm4839_vm0, %v3587_v52 }
  0xa9   : > { %2807 = vmatprep.mubr.msk.f32.mxu0 %vm4839_vm0, %v3600_v57 }
  0xac   : > { %2808 = vmatmul.mubr.msk.f32.gmra.mrb[22].mxu0 %vm4839_vm0, %v262_v58  ;;  %v970_v58 = vadd.s32 4294967248, %v3670_v35 }
  0xad   : > { %2810 = vmatprep.mubr.msk.f32.mxu0 %vm4839_vm0, %v263_v62 }
  0xae   : > { %v3723_v2 = vsub.s32 %v970_v58, %v3674_v38 }
  0xb0   : > { %2811 = vmatmul.mubr.msk.f32.gmra.mrb[24].mxu0 %vm4839_vm0, %v264_v1  ;;  %v977_v1 = vadd.s32 4294967240, %v3670_v35  ;;  %4900 = vst [vmem:[#allocation18_spill] sm:$0xff] %v3723_v2 }
  0xb1   : > { %2813 = vmatprep.mubr.msk.f32.mxu0 %vm4839_vm0, %v265_v5  ;;  %v984_v5 = vadd.s32 4294967232, %v3670_v35 }
  0xb2   : > { %v3733_v8 = vsub.s32 %v977_v1, %v3674_v38 }
  0xb4   : > { %2814 = vmatmul.mubr.msk.f32.gmra.mrb[26].mxu0 %vm4839_vm0, %v266_v7  ;;  %4901 = vst [vmem:[#allocation19_spill] sm:$0xff] %v3733_v8 }
  0xb5   : > { %2816 = vmatprep.mubr.msk.f32.mxu0 %vm4839_vm0, %v267_v11  ;;  %v3739_v11 = vsub.s32 %v984_v5, %v3674_v38 }
  0xb7   : > { %4902 = vst [vmem:[#allocation20_spill] sm:$0xff] %v3739_v11 }
  0xb8   : > { %2817 = vmatmul.mubr.msk.f32.gmra.mrb[28].mxu0 %vm4839_vm0, %v268_v13 }
  0xb9   : > { %2819 = vmatprep.mubr.msk.f32.mxu0 %vm4839_vm0, %v269_v17  ;;  %v3749_v17 = vsub.s32 %v991_v12, %v3674_v38 }
  0xbb   : > { %4903 = vst [vmem:[#allocation21_spill] sm:$0xff] %v3749_v17 }
  0xbc   : > { %2820 = vmatmul.mubr.msk.f32.gmra.mrb[30].mxu0 %vm4839_vm0, %v270_v19  ;;  %vm1086_vm0 = vcmp.lt.s32.totalorder %v3670_v35, 64 }
  0xce   : > { %v803_v27 = vpop.xlane.xlu0 %802 }
  0xcf   : > { %v809_v26 = vpop.xlane.xlu1 %808  ;;  %v934_v46 = vrot.slane %v803_v27, %v3680_v41 }
  0xd0   : > { %v946_v51 = vrot.slane %v809_v26, %v3691_v0  ;;  %v1012_v26 = vadd.s32 4294967200, %v3670_v35 }
  0xd2   : > { %v806_v29 = vpop.xlane.xlu0 %805  ;;  %v3773_v32 = vsub.s32 %v1012_v26, %v3674_v38 }
  0xd3   : > { %v812_v28 = vpop.xlane.xlu1 %811  ;;  %v939_v47 = vrot.slane %v806_v29, %v3683_v42 }
  0xd4   : > { %v953_v55 = vrot.slane %v812_v28, %v3697_v49  ;;  %v3766_v28 = vsub.s32 %v1005_v21, %v3674_v38  ;;  %4906 = vst [vmem:[#allocation24_spill] sm:$0xff] %v3773_v32 }
  0xd5   : > { %v941_v53 = vsel %vm940_vm2, %v939_v47, %v934_v46 }
  0xd6   : > { %v815_v31 = vpop.xlane.xlu0 %814  ;;  %v948_v57 = vsel %vm947_vm3, %v946_v51, %v941_v53  ;;  %4905 = vst [vmem:[#allocation23_spill] sm:$0xff] %v3766_v28 }
  0xd7   : > { %v818_v30 = vpop.xlane.xlu1 %817  ;;  %v960_v61 = vrot.slane %v815_v31, %v3707_v56  ;;  %v955_v62 = vsel %vm954_vm4, %v953_v55, %v948_v57  ;;  %v1019_v31 = vadd.s32 4294967192, %v3670_v35 }
  0xd8   : > { %v967_v3 = vrot.slane %v818_v30, %v3713_v59 }
  0xd9   : > { %v962_v6 = vsel %vm961_vm5, %v960_v61, %v955_v62  ;;  %v3784_v40 = vsub.s32 %v1019_v31, %v3674_v38 }
  0xda   : > { %v821_v34 = vpop.xlane.xlu0 %820  ;;  %v969_v10 = vsel %vm968_vm6, %v967_v3, %v962_v6 }
  0xdb   : > { %v824_v33 = vpop.xlane.xlu1 %823  ;;  %v974_v9 = vrot.slane %v821_v34, %v3723_v2  ;;  %4907 = vst [vmem:[#allocation25_spill] sm:$0xff] %v3784_v40 }
  0xdc   : > { %v981_v13 = vrot.slane %v824_v33, %v3733_v8 }
  0xdd   : > { %v976_v15 = vsel %vm975_vm7, %v974_v9, %v969_v10 }
  0xde   : > { %v827_v37 = vpop.xlane.xlu0 %826  ;;  %v983_v20 = vsel %vm982_vm8, %v981_v13, %v976_v15 }
  0xdf   : > { %v3672_v36 = vpop.xlane.xlu1 %829  ;;  %v988_v19 = vrot.slane %v827_v37, %v3739_v11  ;;  %v1026_v37 = vadd.s32 4294967184, %v3670_v35 }
  0xe0   : > { %v995_v24 = vrot.slane %v3672_v36, %v3749_v17 }
  0xe1   : > { %v990_v25 = vsel %vm989_vm9, %v988_v19, %v983_v20  ;;  %v3791_v46 = vsub.s32 %v1026_v37, %v3674_v38 }
  0xe2   : > { %v3687_v44 = vpop.xlane.xlu0 %832  ;;  %v997_v30 = vsel %vm996_vm10, %v995_v24, %v990_v25 }
  0xe3   : > { %v3685_v43 = vpop.xlane.xlu1 %835  ;;  %v1002_v29 = vrot.slane %v3687_v44, %v3755_v22  ;;  %4908 = vst [vmem:[#allocation26_spill] sm:$0xff] %v3791_v46 }
  0xe4   : > { %v1009_v33 = vrot.slane %v3685_v43, %v3766_v28  ;;  %v1033_v43 = vadd.s32 4294967176, %v3670_v35 }
  0xe5   : > { %v1004_v36 = vsel %vm1003_vm11, %v1002_v29, %v997_v30 }
  0xe6   : > { %v3702_v52 = vpop.xlane.xlu0 %838  ;;  %v1011_v45 = vsel %vm1010_vm12, %v1009_v33, %v1004_v36 }
  0xe7   : > { %v3699_v50 = vpop.xlane.xlu1 %841  ;;  %v1016_v44 = vrot.slane %v3702_v52, %v3773_v32  ;;  %v3801_v52 = vsub.s32 %v1033_v43, %v3674_v38 }
  0xe8   : > { %v1023_v47 = vrot.slane %v3699_v50, %v3784_v40 }
  0xe9   : > { %v1018_v51 = vsel %vm1017_vm13, %v1016_v44, %v1011_v45  ;;  %4909 = vst [vmem:[#allocation27_spill] sm:$0xff] %v3801_v52 }
  0xea   : > { %v3718_v63 = vpop.xlane.xlu0 %844  ;;  %v1025_v55 = vsel %vm4885_vm14, %v1023_v47, %v1018_v51 }
  0xeb   : > { %v3715_v60 = vpop.xlane.xlu1 %847  ;;  %v1030_v54 = vrot.slane %v3718_v63, %v3791_v46 }
  0xec   : > { %v1037_v57 = vrot.slane %v3715_v60, %v3801_v52 }
  0xed   : > { %v1032_v61 = vsel %vm4841_vm15, %v1030_v54, %v1025_v55 }
  0xee   : > { %v3730_v7 = vpop.xlane.xlu0 %690  ;;  %v3815_v63 = vsel %vm4840_vm1, %v1037_v57, %v1032_v61 }
  0xef   : > { %v3726_v4 = vpop.xlane.xlu1 %693 }
  0xf2   : > { %v3746_v18 = vpop.xlane.xlu0 %696 }
  0xf3   : > { %v3742_v14 = vpop.xlane.xlu1 %699 }
  0xf6   : > { %v3763_v27 = vpop.xlane.xlu0 %702 }
  0xf7   : > { %v3759_v23 = vpop.xlane.xlu1 %705 }
  0xfa   : > { %v3781_v39 = vpop.xlane.xlu0 %708 }
  0xfb   : > { %v3777_v34 = vpop.xlane.xlu1 %711 }
  0xfe   : > { %v3798_v53 = vpop.xlane.xlu0 %714 }
  0xff   : > { %v3795_v48 = vpop.xlane.xlu1 %717 }
 0x102   : > { %v3811_v3 = vpop.xlane.xlu0 %720 }
 0x103   : > { %v3808_v58 = vpop.xlane.xlu1 %723 }
 0x106   : > { %v3828_v20 = vpop.xlane.xlu0 %726 }
 0x107   : > { %v3821_v16 = vpop.xlane.xlu1 %729 }
 0x10a   : > { %v3854_v47 = vpop.xlane.xlu0 %732 }
 0x10b   : > { %v3850_v44 = vpop.xlane.xlu1 %735 }
 0x153   : > { %v2776_v50 = vpop.f32.mrb[0].mxu0 }
 0x154   : > { %v850_v62 = vmul.f32 2.0, %v2776_v50  ;;  %v498_v1 = vpop.f32.mrb[1].mxu0 }
 0x155   : > { %v849_v38 = vmul.f32 2.0, %v498_v1 }
 0x156   : > { %v882_v6 = vsub.f32 %v3726_v4, %v850_v62 }
 0x157   : > { %v881_v5 = vsub.f32 %v3730_v7, %v849_v38  ;;  %v2779_v9 = vpop.f32.mrb[2].mxu0 }
 0x158   : > { %v852_v60 = vmul.f32 2.0, %v2779_v9  ;;  %v508_v10 = vpop.f32.mrb[3].mxu0  ;;  %v1055_v12 = vadd.f32 %v3815_v63, %v882_v6 }
 0x159   : > { %v851_v13 = vmul.f32 2.0, %v508_v10  ;;  %v1054_v15 = vadd.f32 %v3815_v63, %v881_v5  ;;  %v3871_v5 = vpop.xlane.xlu1 %741 }
 0x15a   : > { %v884_v19 = vsub.f32 %v3742_v14, %v852_v60  ;;  %v3826_v4 = vsel %vm1086_vm0, %v1055_v12, 1e+30  ;;  %v3878_v60 = vpop.xlane.xlu0 %738 }
 0x15b   : > { %v883_v7 = vsub.f32 %v3746_v18, %v851_v13  ;;  %1121 = vmin.xlane.f32.xlu1 %v3826_v4  ;;  %v2782_v21 = vpop.f32.mrb[4].mxu0  ;;  %v3834_v24 = vsel %vm1086_vm0, %v1054_v15, 1e+30 }
 0x15c   : > { %v854_v25 = vmul.f32 2.0, %v2782_v21  ;;  %1119 = vmin.xlane.f32.xlu0 %v3834_v24  ;;  %v518_v26 = vpop.f32.mrb[5].mxu0  ;;  %v1057_v14 = vadd.f32 %v3815_v63, %v884_v19 }
 0x15d   : > { %v853_v29 = vmul.f32 2.0, %v518_v26  ;;  %v1056_v30 = vadd.f32 %v3815_v63, %v883_v7 }
 0x15e   : > { %v886_v31 = vsub.f32 %v3759_v23, %v854_v25  ;;  %v3842_v18 = vsel %vm1086_vm0, %v1057_v14, 1e+30 }
 0x15f   : > { %v885_v33 = vsub.f32 %v3763_v27, %v853_v29  ;;  %1125 = vmin.xlane.f32.xlu1 %v3842_v18  ;;  %v2785_v36 = vpop.f32.mrb[6].mxu0  ;;  %v3848_v37 = vsel %vm1086_vm0, %v1056_v30, 1e+30  ;;  %v748_v30 = vpop.xlane.xlu1 %747 }
 0x160   : > { %v856_v45 = vmul.f32 2.0, %v2785_v36  ;;  %1123 = vmin.xlane.f32.xlu0 %v3848_v37  ;;  %v528_v43 = vpop.f32.mrb[7].mxu0  ;;  %v1059_v23 = vadd.f32 %v3815_v63, %v886_v31  ;;  %v745_v36 = vpop.xlane.xlu0 %744 }
 0x161   : > { %v855_v51 = vmul.f32 2.0, %v528_v43  ;;  %v1058_v27 = vadd.f32 %v3815_v63, %v885_v33 }
 0x162   : > { %v888_v54 = vsub.f32 %v3777_v34, %v856_v45  ;;  %v3860_v55 = vsel %vm1086_vm0, %v1059_v23, 1e+30 }
 0x163   : > { %v887_v57 = vsub.f32 %v3781_v39, %v855_v51  ;;  %1129 = vmin.xlane.f32.xlu1 %v3860_v55  ;;  %v2788_v50 = vpop.f32.mrb[8].mxu0  ;;  %v3866_v61 = vsel %vm1086_vm0, %v1058_v27, 1e+30 }
 0x164   : > { %v858_v62 = vmul.f32 2.0, %v2788_v50  ;;  %1127 = vmin.xlane.f32.xlu0 %v3866_v61  ;;  %v538_v1 = vpop.f32.mrb[9].mxu0  ;;  %v1061_v38 = vadd.f32 %v3815_v63, %v888_v54 }
 0x165   : > { %v857_v34 = vmul.f32 2.0, %v538_v1  ;;  %v1060_v6 = vadd.f32 %v3815_v63, %v887_v57 }
 0x166   : > { %v890_v39 = vsub.f32 %v3795_v48, %v858_v62  ;;  %v3876_v9 = vsel %vm1086_vm0, %v1061_v38, 1e+30  ;;  %v754_v38 = vpop.xlane.xlu1 %753 }
 0x167   : > { %v889_v10 = vsub.f32 %v3798_v53, %v857_v34  ;;  %1133 = vmin.xlane.f32.xlu1 %v3876_v9  ;;  %v2791_v12 = vpop.f32.mrb[10].mxu0  ;;  %v3884_v13 = vsel %vm1086_vm0, %v1060_v6, 1e+30  ;;  %v751_v6 = vpop.xlane.xlu0 %750 }
 0x168   : > { %v860_v15 = vmul.f32 2.0, %v2791_v12  ;;  %1131 = vmin.xlane.f32.xlu0 %v3884_v13  ;;  %v548_v19 = vpop.f32.mrb[11].mxu0  ;;  %v1063_v48 = vadd.f32 %v3815_v63, %v890_v39 }
 0x169   : > { %v859_v7 = vmul.f32 2.0, %v548_v19  ;;  %v1062_v21 = vadd.f32 %v3815_v63, %v889_v10 }
 0x16a   : > { %v892_v25 = vsub.f32 %v3808_v58, %v860_v15  ;;  %v3892_v53 = vsel %vm1086_vm0, %v1063_v48, 1e+30 }
 0x16b   : > { %v891_v26 = vsub.f32 %v3811_v3, %v859_v7  ;;  %1137 = vmin.xlane.f32.xlu1 %v3892_v53  ;;  %v2794_v14 = vpop.f32.mrb[12].mxu0  ;;  %v3898_v29 = vsel %vm1086_vm0, %v1062_v21, 1e+30 }
 0x16c   : > { %v862_v31 = vmul.f32 2.0, %v2794_v14  ;;  %1135 = vmin.xlane.f32.xlu0 %v3898_v29  ;;  %v558_v33 = vpop.f32.mrb[13].mxu0  ;;  %v1065_v58 = vadd.f32 %v3815_v63, %v892_v25 }
 0x16d   : > { %v861_v45 = vmul.f32 2.0, %v558_v33  ;;  %v1064_v43 = vadd.f32 %v3815_v63, %v891_v26 }
 0x16e   : > { %v894_v3 = vsub.f32 %v3821_v16, %v862_v31  ;;  %v3906_v23 = vsel %vm1086_vm0, %v1065_v58, 1e+30  ;;  %v760_v31 = vpop.xlane.xlu1 %759 }
 0x16f   : > { %v893_v51 = vsub.f32 %v3828_v20, %v861_v45  ;;  %1141 = vmin.xlane.f32.xlu1 %v3906_v23  ;;  %v2797_v27 = vpop.f32.mrb[14].mxu0  ;;  %v3912_v54 = vsel %vm1086_vm0, %v1064_v43, 1e+30  ;;  %v757_v45 = vpop.xlane.xlu0 %756 }
 0x170   : > { %v864_v57 = vmul.f32 2.0, %v2797_v27  ;;  %1139 = vmin.xlane.f32.xlu0 %v3912_v54  ;;  %v568_v50 = vpop.f32.mrb[15].mxu0  ;;  %v1067_v62 = vadd.f32 %v3815_v63, %v894_v3 }
 0x171   : > { %v863_v16 = vmul.f32 2.0, %v568_v50  ;;  %v1066_v1 = vadd.f32 %v3815_v63, %v893_v51 }
 0x172   : > { %v896_v34 = vsub.f32 %v3850_v44, %v864_v57  ;;  %v3920_v20 = vsel %vm1086_vm0, %v1067_v62, 1e+30 }
 0x173   : > { %v895_v39 = vsub.f32 %v3854_v47, %v863_v16  ;;  %1145 = vmin.xlane.f32.xlu1 %v3920_v20  ;;  %v2800_v10 = vpop.f32.mrb[16].mxu0  ;;  %v3926_v12 = vsel %vm1086_vm0, %v1066_v1, 1e+30 }
 0x174   : > { %v866_v15 = vmul.f32 2.0, %v2800_v10  ;;  %1143 = vmin.xlane.f32.xlu0 %v3926_v12  ;;  %v578_v19 = vpop.f32.mrb[17].mxu0  ;;  %v1069_v44 = vadd.f32 %v3815_v63, %v896_v34 }
 0x175   : > { %v865_v48 = vmul.f32 2.0, %v578_v19  ;;  %v1068_v7 = vadd.f32 %v3815_v63, %v895_v39  ;;  %v766_v39 = vpop.xlane.xlu1 %765 }
 0x176   : > { %v898_v21 = vsub.f32 %v3871_v5, %v866_v15  ;;  %v3934_v47 = vsel %vm1086_vm0, %v1069_v44, 1e+30  ;;  %v763_v15 = vpop.xlane.xlu0 %762 }
 0x177   : > { %v897_v25 = vsub.f32 %v3878_v60, %v865_v48  ;;  %1149 = vmin.xlane.f32.xlu1 %v3934_v47  ;;  %v2803_v26 = vpop.f32.mrb[18].mxu0  ;;  %v3940_v14 = vsel %vm1086_vm0, %v1068_v7, 1e+30 }
 0x178   : > { %v868_v33 = vmul.f32 2.0, %v2803_v26  ;;  %1147 = vmin.xlane.f32.xlu0 %v3940_v14  ;;  %v588_v58 = vpop.f32.mrb[19].mxu0  ;;  %v1071_v5 = vadd.f32 %v3815_v63, %v898_v21 }
 0x179   : > { %v867_v43 = vmul.f32 2.0, %v588_v58  ;;  %v1070_v3 = vadd.f32 %v3815_v63, %v897_v25 }
 0x17a   : > { %v900_v51 = vsub.f32 %v748_v30, %v868_v33  ;;  %v3947_v60 = vsel %vm1086_vm0, %v1071_v5, 1e+30 }
 0x17b   : > { %v899_v27 = vsub.f32 %v745_v36, %v867_v43  ;;  %1153 = vmin.xlane.f32.xlu1 %v3947_v60  ;;  %v2806_v57 = vpop.f32.mrb[20].mxu0  ;;  %v3952_v50 = vsel %vm1086_vm0, %v1070_v3, 1e+30  ;;  %v772_v3 = vpop.xlane.xlu1 %771 }
 0x17c   : > { %v870_v62 = vmul.f32 2.0, %v2806_v57  ;;  %1151 = vmin.xlane.f32.xlu0 %v3952_v50  ;;  %v598_v16 = vpop.f32.mrb[21].mxu0  ;;  %v1073_v1 = vadd.f32 %v3815_v63, %v900_v51 }
 0x17d   : > { %v869_v34 = vmul.f32 2.0, %v598_v16  ;;  %v1072_v30 = vadd.f32 %v3815_v63, %v899_v27 }
 0x17e   : > { %v902_v10 = vsub.f32 %v754_v38, %v870_v62  ;;  %v3959_v36 = vsel %vm1086_vm0, %v1073_v1, 1e+30 }
 0x17f   : > { %v901_v19 = vsub.f32 %v751_v6, %v869_v34  ;;  %1157 = vmin.xlane.f32.xlu1 %v3959_v36  ;;  %v2809_v44 = vpop.f32.mrb[22].mxu0  ;;  %v3964_v48 = vsel %vm1086_vm0, %v1072_v30, 1e+30 }
 0x180   : > { %v872_v7 = vmul.f32 2.0, %v2809_v44  ;;  %1155 = vmin.xlane.f32.xlu0 %v3964_v48  ;;  %v608_v21 = vpop.f32.mrb[23].mxu0  ;;  %v1075_v25 = vadd.f32 %v3815_v63, %v902_v10 }
 0x181   : > { %v871_v38 = vmul.f32 2.0, %v608_v21  ;;  %v1074_v26 = vadd.f32 %v3815_v63, %v901_v19 }
 0x182   : > { %v904_v33 = vsub.f32 %v760_v31, %v872_v7  ;;  %v3971_v6 = vsel %vm1086_vm0, %v1075_v25, 1e+30  ;;  %v769_v31 = vpop.xlane.xlu0 %768  ;;  %v778_v25 = vpop.xlane.xlu1 %777 }
 0x183   : > { %v903_v58 = vsub.f32 %v757_v45, %v871_v38  ;;  %1161 = vmin.xlane.f32.xlu1 %v3971_v6  ;;  %v2812_v5 = vpop.f32.mrb[24].mxu0  ;;  %v3976_v43 = vsel %vm1086_vm0, %v1074_v26, 1e+30 }
 0x184   : > { %v874_v51 = vmul.f32 2.0, %v2812_v5  ;;  %1159 = vmin.xlane.f32.xlu0 %v3976_v43  ;;  %v618_v27 = vpop.f32.mrb[25].mxu0  ;;  %v1077_v57 = vadd.f32 %v3815_v63, %v904_v33 }
 0x185   : > { %v873_v62 = vmul.f32 2.0, %v618_v27  ;;  %v1076_v16 = vadd.f32 %v3815_v63, %v903_v58 }
 0x186   : > { %v906_v1 = vsub.f32 %v766_v39, %v874_v51  ;;  %v3983_v45 = vsel %vm1086_vm0, %v1077_v57, 1e+30  ;;  %v775_v26 = vpop.xlane.xlu0 %774 }
 0x187   : > { %v905_v34 = vsub.f32 %v763_v15, %v873_v62  ;;  %1165 = vmin.xlane.f32.xlu1 %v3983_v45  ;;  %v2815_v30 = vpop.f32.mrb[26].mxu0  ;;  %v3988_v10 = vsel %vm1086_vm0, %v1076_v16, 1e+30 }
 0x188   : > { %v876_v19 = vmul.f32 2.0, %v2815_v30  ;;  %1163 = vmin.xlane.f32.xlu0 %v3988_v10  ;;  %v628_v44 = vpop.f32.mrb[27].mxu0  ;;  %v1079_v7 = vadd.f32 %v3815_v63, %v906_v1 }
 0x189   : > { %v875_v21 = vmul.f32 2.0, %v628_v44  ;;  %v1078_v39 = vadd.f32 %v3815_v63, %v905_v34 }
 0x18a   : > { %v908_v38 = vsub.f32 %v772_v3, %v876_v19  ;;  %v3995_v15 = vsel %vm1086_vm0, %v1079_v7, 1e+30  ;;  %v784_v19 = vpop.xlane.xlu1 %783 }
 0x18b   : > { %v907_v33 = vsub.f32 %v769_v31, %v875_v21  ;;  %1169 = vmin.xlane.f32.xlu1 %v3995_v15  ;;  %v2818_v58 = vpop.f32.mrb[28].mxu0  ;;  %v4000_v5 = vsel %vm1086_vm0, %v1078_v39, 1e+30  ;;  %v781_v21 = vpop.xlane.xlu0 %780 }
 0x18c   : > { %v878_v51 = vmul.f32 2.0, %v2818_v58  ;;  %1167 = vmin.xlane.f32.xlu0 %v4000_v5  ;;  %v638_v27 = vpop.f32.mrb[29].mxu0  ;;  %v1081_v57 = vadd.f32 %v3815_v63, %v908_v38 }
 0x18d   : > { %v877_v3 = vmul.f32 2.0, %v638_v27  ;;  %v1080_v62 = vadd.f32 %v3815_v63, %v907_v33 }
 0x18e   : > { %v910_v16 = vsub.f32 %v778_v25, %v878_v51  ;;  %v4007_v31 = vsel %vm1086_vm0, %v1081_v57, 1e+30 }
 0x18f   : > { %v909_v1 = vsub.f32 %v775_v26, %v877_v3  ;;  %1173 = vmin.xlane.f32.xlu1 %v4007_v31  ;;  %v2821_v34 = vpop.f32.mrb[30].mxu0  ;;  %v4012_v30 = vsel %vm1086_vm0, %v1080_v62, 1e+30 }
 0x190   : > { %v880_v44 = vmul.f32 2.0, %v2821_v34  ;;  %1171 = vmin.xlane.f32.xlu0 %v4012_v30  ;;  %v648_v7 = vpop.f32.mrb[31].mxu0  ;;  %v1083_v39 = vadd.f32 %v3815_v63, %v910_v16 }
 0x191   : > { %v879_v25 = vmul.f32 2.0, %v648_v7  ;;  %v1082_v38 = vadd.f32 %v3815_v63, %v909_v1 }
 0x192   : > { %v912_v33 = vsub.f32 %v784_v19, %v880_v44  ;;  %v4019_v26 = vsel %vm1086_vm0, %v1083_v39, 1e+30 }
 0x193   : > { %v911_v58 = vsub.f32 %v781_v21, %v879_v25  ;;  %1177 = vmin.xlane.f32.xlu1 %v4019_v26  ;;  %v4024_v51 = vsel %vm1086_vm0, %v1082_v38, 1e+30 }
 0x194   : > { %1175 = vmin.xlane.f32.xlu0 %v4024_v51  ;;  %v1085_v27 = vadd.f32 %v3815_v63, %v912_v33 }
 0x195   : > { %v1084_v57 = vadd.f32 %v3815_v63, %v911_v58 }
 0x196   : > { %v4031_v3 = vsel %vm1086_vm0, %v1085_v27, 1e+30 }
 0x197   : > { %1181 = vmin.xlane.f32.xlu1 %v4031_v3  ;;  %v4036_v62 = vsel %vm1086_vm0, %v1084_v57, 1e+30 }
 0x198   : > { %1179 = vmin.xlane.f32.xlu0 %v4036_v62 }
 0x1e8   : > { %v1122_v16 = vpop.xlane.xlu1 %1121 }
 0x1e9   : > { %vm1184_vm1 = vcmp.eq.f32.partialorder %v3826_v4, %v1122_v16  ;;  %v1120_v1 = vpop.xlane.xlu0 %1119 }
 0x1ea   : > { %v4041_v34 = vsel %vm1184_vm1, %v3670_v35, 128  ;;  %vm1183_vm15 = vcmp.eq.f32.partialorder %v3834_v24, %v1120_v1 }
 0x1eb   : > { %v4045_v63 = vsel %vm1183_vm15, %v3670_v35, 128  ;;  %v1262_v19 = vshra.s32 %v4041_v34, 16 }
 0x1ec   : > { %v1126_v44 = vpop.xlane.xlu1 %1125  ;;  %v1248_v7 = vshra.s32 %v4045_v63, 16 }
 0x1ed   : > { %vm1186_vm0 = vcmp.eq.f32.partialorder %v3842_v18, %v1126_v44  ;;  %v1124_v21 = vpop.xlane.xlu0 %1123  ;;  %v4050_v39 = vcvt.s32.f32 %v1262_v19 }
 0x1ee   : > { %v4053_v4 = vsel %vm1186_vm0, %v3670_v35, 128  ;;  %vm1185_vm1 = vcmp.eq.f32.partialorder %v3848_v37, %v1124_v21  ;;  %v4056_v25 = vcvt.s32.f32 %v1248_v7 }
 0x1ef   : > { %v4059_v24 = vsel %vm1185_vm1, %v3670_v35, 128  ;;  %1265 = vmin.xlane.f32.xlu1 %v4050_v39  ;;  %v1290_v38 = vshra.s32 %v4053_v4, 16 }
 0x1f0   : > { %v1130_v33 = vpop.xlane.xlu1 %1129  ;;  %1251 = vmin.xlane.f32.xlu0 %v4056_v25  ;;  %v1276_v18 = vshra.s32 %v4059_v24, 16 }
 0x1f1   : > { %vm1188_vm15 = vcmp.eq.f32.partialorder %v3860_v55, %v1130_v33  ;;  %v1128_v58 = vpop.xlane.xlu0 %1127  ;;  %v4066_v27 = vcvt.s32.f32 %v1290_v38 }
 0x1f2   : > { %v4069_v37 = vsel %vm1188_vm15, %v3670_v35, 128  ;;  %vm1187_vm0 = vcmp.eq.f32.partialorder %v3866_v61, %v1128_v58  ;;  %v4072_v57 = vcvt.s32.f32 %v1276_v18 }
 0x1f3   : > { %v4075_v16 = vsel %vm1187_vm0, %v3670_v35, 128  ;;  %1293 = vmin.xlane.f32.xlu1 %v4066_v27  ;;  %v1318_v1 = vshra.s32 %v4069_v37, 16 }
 0x1f4   : > { %v1134_v19 = vpop.xlane.xlu1 %1133  ;;  %1279 = vmin.xlane.f32.xlu0 %v4072_v57  ;;  %v1304_v55 = vshra.s32 %v4075_v16, 16 }
 0x1f5   : > { %vm1190_vm1 = vcmp.eq.f32.partialorder %v3876_v9, %v1134_v19  ;;  %v1132_v44 = vpop.xlane.xlu0 %1131  ;;  %v4082_v7 = vcvt.s32.f32 %v1318_v1 }
 0x1f6   : > { %v4085_v61 = vsel %vm1190_vm1, %v3670_v35, 128  ;;  %vm1189_vm15 = vcmp.eq.f32.partialorder %v3884_v13, %v1132_v44  ;;  %v4088_v21 = vcvt.s32.f32 %v1304_v55 }
 0x1f7   : > { %v4091_v38 = vsel %vm1189_vm15, %v3670_v35, 128  ;;  %1321 = vmin.xlane.f32.xlu1 %v4082_v7  ;;  %v1346_v33 = vshra.s32 %v4085_v61, 16 }
 0x1f8   : > { %v1138_v18 = vpop.xlane.xlu1 %1137  ;;  %1307 = vmin.xlane.f32.xlu0 %v4088_v21  ;;  %v1332_v9 = vshra.s32 %v4091_v38, 16 }
 0x1f9   : > { %vm1192_vm0 = vcmp.eq.f32.partialorder %v3892_v53, %v1138_v18  ;;  %v1136_v58 = vpop.xlane.xlu0 %1135  ;;  %v4098_v1 = vcvt.s32.f32 %v1346_v33 }
 0x1fa   : > { %v4101_v13 = vsel %vm1192_vm0, %v3670_v35, 128  ;;  %vm1191_vm1 = vcmp.eq.f32.partialorder %v3898_v29, %v1136_v58  ;;  %v4104_v19 = vcvt.s32.f32 %v1332_v9 }
 0x1fb   : > { %v4107_v55 = vsel %vm1191_vm1, %v3670_v35, 128  ;;  %1349 = vmin.xlane.f32.xlu1 %v4098_v1  ;;  %v1374_v44 = vshra.s32 %v4101_v13, 16 }
 0x1fc   : > { %v1142_v52 = vpop.xlane.xlu1 %1141  ;;  %1335 = vmin.xlane.f32.xlu0 %v4104_v19  ;;  %v1360_v53 = vshra.s32 %v4107_v55, 16 }
 0x1fd   : > { %vm1194_vm15 = vcmp.eq.f32.partialorder %v3906_v23, %v1142_v52  ;;  %v1140_v33 = vpop.xlane.xlu0 %1139  ;;  %v4114_v18 = vcvt.s32.f32 %v1374_v44 }
 0x1fe   : > { %v4117_v29 = vsel %vm1194_vm15, %v3670_v35, 128  ;;  %vm1193_vm0 = vcmp.eq.f32.partialorder %v3912_v54, %v1140_v33  ;;  %v4120_v9 = vcvt.s32.f32 %v1360_v53 }
 0x1ff   : > { %v4123_v58 = vsel %vm1193_vm0, %v3670_v35, 128  ;;  %1377 = vmin.xlane.f32.xlu1 %v4114_v18  ;;  %v1402_v46 = vshra.s32 %v4117_v29, 16 }
 0x200   : > { %v1146_v40 = vpop.xlane.xlu1 %1145  ;;  %1363 = vmin.xlane.f32.xlu0 %v4120_v9  ;;  %v1388_v52 = vshra.s32 %v4123_v58, 16 }
 0x201   : > { %vm1196_vm1 = vcmp.eq.f32.partialorder %v3920_v20, %v1146_v40  ;;  %v1144_v23 = vpop.xlane.xlu0 %1143  ;;  %v4130_v44 = vcvt.s32.f32 %v1402_v46 }
 0x202   : > { %v4133_v54 = vsel %vm1196_vm1, %v3670_v35, 128  ;;  %vm1195_vm15 = vcmp.eq.f32.partialorder %v3926_v12, %v1144_v23  ;;  %v4136_v53 = vcvt.s32.f32 %v1388_v52 }
 0x203   : > { %v4139_v33 = vsel %vm1195_vm15, %v3670_v35, 128  ;;  %1405 = vmin.xlane.f32.xlu1 %v4130_v44  ;;  %v1430_v32 = vshra.s32 %v4133_v54, 16 }
 0x204   : > { %v1150_v28 = vpop.xlane.xlu1 %1149  ;;  %1391 = vmin.xlane.f32.xlu0 %v4136_v53  ;;  %v1416_v40 = vshra.s32 %v4139_v33, 16 }
 0x205   : > { %vm1198_vm0 = vcmp.eq.f32.partialorder %v3934_v47, %v1150_v28  ;;  %v1148_v46 = vpop.xlane.xlu0 %1147  ;;  %v4146_v20 = vcvt.s32.f32 %v1430_v32 }
 0x206   : > { %v4149_v12 = vsel %vm1198_vm0, %v3670_v35, 128  ;;  %vm1197_vm1 = vcmp.eq.f32.partialorder %v3940_v14, %v1148_v46  ;;  %v4152_v52 = vcvt.s32.f32 %v1416_v40 }
 0x207   : > { %v4155_v23 = vsel %vm1197_vm1, %v3670_v35, 128  ;;  %1433 = vmin.xlane.f32.xlu1 %v4146_v20  ;;  %v1458_v22 = vshra.s32 %v4149_v12, 16 }
 0x208   : > { %v1154_v17 = vpop.xlane.xlu1 %1153  ;;  %1419 = vmin.xlane.f32.xlu0 %v4152_v52  ;;  %v1444_v28 = vshra.s32 %v4155_v23, 16 }
 0x209   : > { %vm1200_vm15 = vcmp.eq.f32.partialorder %v3947_v60, %v1154_v17  ;;  %v1152_v32 = vpop.xlane.xlu0 %1151  ;;  %v4162_v47 = vcvt.s32.f32 %v1458_v22 }
 0x20a   : > { %v4165_v14 = vsel %vm1200_vm15, %v3670_v35, 128  ;;  %vm1199_vm0 = vcmp.eq.f32.partialorder %v3952_v50, %v1152_v32  ;;  %v4168_v40 = vcvt.s32.f32 %v1444_v28 }
 0x20b   : > { %v4171_v46 = vsel %vm1199_vm0, %v3670_v35, 128  ;;  %1461 = vmin.xlane.f32.xlu1 %v4162_v47  ;;  %v1486_v11 = vshra.s32 %v4165_v14, 16 }
 0x20c   : > { %v1158_v8 = vpop.xlane.xlu1 %1157  ;;  %1447 = vmin.xlane.f32.xlu0 %v4168_v40  ;;  %v1472_v17 = vshra.s32 %v4171_v46, 16 }
 0x20d   : > { %vm1202_vm1 = vcmp.eq.f32.partialorder %v3959_v36, %v1158_v8  ;;  %v1156_v22 = vpop.xlane.xlu0 %1155  ;;  %v4178_v60 = vcvt.s32.f32 %v1486_v11 }
 0x20e   : > { %v4181_v50 = vsel %vm1202_vm1, %v3670_v35, 128  ;;  %vm1201_vm15 = vcmp.eq.f32.partialorder %v3964_v48, %v1156_v22  ;;  %v4184_v28 = vcvt.s32.f32 %v1472_v17 }
 0x20f   : > { %v1514_v32 = vshra.s32 %v4181_v50, 16  ;;  %v4188_v2 = vsel %vm1201_vm15, %v3670_v35, 128  ;;  %1489 = vmin.xlane.f32.xlu1 %v4178_v60 }
 0x210   : > { %v1500_v59 = vshra.s32 %v4188_v2, 16  ;;  %v1162_v8 = vpop.xlane.xlu1 %1161  ;;  %1475 = vmin.xlane.f32.xlu0 %v4184_v28 }
 0x211   : > { %v4193_v11 = vcvt.s32.f32 %v1514_v32  ;;  %vm1204_vm0 = vcmp.eq.f32.partialorder %v3971_v6, %v1162_v8  ;;  %v1160_v36 = vpop.xlane.xlu0 %1159 }
 0x212   : > { %v4196_v48 = vcvt.s32.f32 %v1500_v59  ;;  %v4199_v17 = vsel %vm1204_vm0, %v3670_v35, 128  ;;  %vm1203_vm1 = vcmp.eq.f32.partialorder %v3976_v43, %v1160_v36 }
 0x213   : > { %v1542_v22 = vshra.s32 %v4199_v17, 16  ;;  %v4204_v56 = vsel %vm1203_vm1, %v3670_v35, 128  ;;  %1517 = vmin.xlane.f32.xlu1 %v4193_v11 }
 0x214   : > { %v1528_v32 = vshra.s32 %v4204_v56, 16  ;;  %v1166_v49 = vpop.xlane.xlu1 %1165  ;;  %1503 = vmin.xlane.f32.xlu0 %v4196_v48 }
 0x215   : > { %v4209_v6 = vcvt.s32.f32 %v1542_v22  ;;  %vm1206_vm15 = vcmp.eq.f32.partialorder %v3983_v45, %v1166_v49  ;;  %v1164_v59 = vpop.xlane.xlu0 %1163 }
 0x216   : > { %v4212_v8 = vcvt.s32.f32 %v1528_v32  ;;  %v4215_v43 = vsel %vm1206_vm15, %v3670_v35, 128  ;;  %vm1205_vm0 = vcmp.eq.f32.partialorder %v3988_v10, %v1164_v59 }
 0x217   : > { %v1570_v36 = vshra.s32 %v4215_v43, 16  ;;  %v4220_v0 = vsel %vm1205_vm0, %v3670_v35, 128  ;;  %1545 = vmin.xlane.f32.xlu1 %v4209_v6 }
 0x218   : > { %4910 = vst [vmem:[#allocation28_spill] sm:$0xff] %v4212_v8  ;;  %v1556_v22 = vshra.s32 %v4220_v0, 16  ;;  %v1170_v41 = vpop.xlane.xlu1 %1169  ;;  %1531 = vmin.xlane.f32.xlu0 %v4212_v8 }
 0x219   : > { %v4225_v49 = vcvt.s32.f32 %v1570_v36  ;;  %vm1208_vm1 = vcmp.eq.f32.partialorder %v3995_v15, %v1170_v41  ;;  %v1168_v45 = vpop.xlane.xlu0 %1167 }
 0x21a   : > { %v4228_v32 = vcvt.s32.f32 %v1556_v22  ;;  %v4231_v10 = vsel %vm1208_vm1, %v3670_v35, 128  ;;  %vm1207_vm15 = vcmp.eq.f32.partialorder %v4000_v5, %v1168_v45 }
 0x21b   : > { %4911 = vst [vmem:[#allocation29_spill] sm:$0xff] %v4225_v49  ;;  %v1598_v59 = vshra.s32 %v4231_v10, 16  ;;  %v4236_v42 = vsel %vm1207_vm15, %v3670_v35, 128  ;;  %1573 = vmin.xlane.f32.xlu1 %v4225_v49 }
 0x21c   : > { %4912 = vst [vmem:[#allocation30_spill] sm:$0xff] %v4228_v32  ;;  %v1584_v36 = vshra.s32 %v4236_v42, 16  ;;  %v1174_v8 = vpop.xlane.xlu1 %1173  ;;  %1559 = vmin.xlane.f32.xlu0 %v4228_v32 }
 0x21d   : > { %v4241_v41 = vcvt.s32.f32 %v1598_v59  ;;  %vm1210_vm0 = vcmp.eq.f32.partialorder %v4007_v31, %v1174_v8  ;;  %v1172_v15 = vpop.xlane.xlu0 %1171 }
 0x21e   : > { %v4244_v22 = vcvt.s32.f32 %v1584_v36  ;;  %v4247_v5 = vsel %vm1210_vm0, %v3670_v35, 128  ;;  %vm1209_vm1 = vcmp.eq.f32.partialorder %v4012_v30, %v1172_v15 }
 0x21f   : > { %4913 = vst [vmem:[#allocation31_spill] sm:$0xff] %v4241_v41  ;;  %v1626_v45 = vshra.s32 %v4247_v5, 16  ;;  %v4252_v49 = vsel %vm1209_vm1, %v3670_v35, 128  ;;  %1601 = vmin.xlane.f32.xlu1 %v4241_v41 }
 0x220   : > { %4914 = vst [vmem:[#allocation32_spill] sm:$0xff] %v4244_v22  ;;  %v1612_v59 = vshra.s32 %v4252_v49, 16  ;;  %v1178_v32 = vpop.xlane.xlu1 %1177  ;;  %1587 = vmin.xlane.f32.xlu0 %v4244_v22 }
 0x221   : > { %v4257_v31 = vcvt.s32.f32 %v1626_v45  ;;  %vm1212_vm15 = vcmp.eq.f32.partialorder %v4019_v26, %v1178_v32  ;;  %v1176_v8 = vpop.xlane.xlu0 %1175 }
 0x222   : > { %v4260_v36 = vcvt.s32.f32 %v1612_v59  ;;  %v4263_v30 = vsel %vm1212_vm15, %v3670_v35, 128  ;;  %vm1211_vm0 = vcmp.eq.f32.partialorder %v4024_v51, %v1176_v8 }
 0x223   : > { %4915 = vst [vmem:[#allocation33_spill] sm:$0xff] %v4257_v31  ;;  %v1654_v15 = vshra.s32 %v4263_v30, 16  ;;  %v4268_v41 = vsel %vm1211_vm0, %v3670_v35, 128  ;;  %1629 = vmin.xlane.f32.xlu1 %v4257_v31 }
 0x224   : > { %v1640_v45 = vshra.s32 %v4268_v41, 16  ;;  %v1182_v22 = vpop.xlane.xlu1 %1181  ;;  %1615 = vmin.xlane.f32.xlu0 %v4260_v36 }
 0x225   : > { %v4273_v26 = vcvt.s32.f32 %v1654_v15  ;;  %vm1214_vm1 = vcmp.eq.f32.partialorder %v4031_v3, %v1182_v22  ;;  %v1180_v32 = vpop.xlane.xlu0 %1179 }
 0x226   : > { %v4276_v59 = vcvt.s32.f32 %v1640_v45  ;;  %v4279_v51 = vsel %vm1214_vm1, %v3670_v35, 128  ;;  %vm1213_vm15 = vcmp.eq.f32.partialorder %v4036_v62, %v1180_v32  ;;  %v1261_v62 = vand.u32 65535, %v4041_v34 }
 0x227   : > { %4916 = vst [vmem:[#allocation34_spill] sm:$0xff] %v4273_v26  ;;  %v1682_v8 = vshra.s32 %v4279_v51, 16  ;;  %v4284_v31 = vsel %vm1213_vm15, %v3670_v35, 128  ;;  %1657 = vmin.xlane.f32.xlu1 %v4273_v26  ;;  %v1247_v45 = vand.u32 65535, %v4045_v63  ;;  %v1289_v35 = vand.u32 65535, %v4053_v4 }
 0x228   : > { %4917 = vst [vmem:[#allocation35_spill] sm:$0xff] %v4276_v59  ;;  %4918 = vst [vmem:[#allocation36_spill] sm:$0xff] %v4284_v31  ;;  %v1668_v15 = vshra.s32 %v4284_v31, 16  ;;  %1643 = vmin.xlane.f32.xlu0 %v4276_v59  ;;  %v1263_v32 = vcvt.s32.f32 %v1261_v62  ;;  %v1275_v59 = vand.u32 65535, %v4059_v24  ;;  %v1317_v62 = vand.u32 65535, %v4069_v37 }
 0x229   : > { %v4289_v3 = vcvt.s32.f32 %v1682_v8  ;;  %v1249_v31 = vcvt.s32.f32 %v1247_v45  ;;  %v1291_v63 = vcvt.s32.f32 %v1289_v35  ;;  %v1303_v24 = vand.u32 65535, %v4075_v16 }
 0x22a   : > { %v4291_v22 = vcvt.s32.f32 %v1668_v15  ;;  %v1277_v45 = vcvt.s32.f32 %v1275_v59  ;;  %v1319_v35 = vcvt.s32.f32 %v1317_v62  ;;  %v1345_v37 = vand.u32 65535, %v4085_v61 }
 0x22b   : > { %1685 = vmin.xlane.f32.xlu1 %v4289_v3  ;;  %v1305_v59 = vcvt.s32.f32 %v1303_v24  ;;  %v1331_v16 = vand.u32 65535, %v4091_v38  ;;  %v1373_v61 = vand.u32 65535, %v4101_v13  ;;  %v1359_v38 = vand.u32 65535, %v4107_v55 }
 0x22c   : > { %1671 = vmin.xlane.f32.xlu0 %v4291_v22  ;;  %v1401_v13 = vand.u32 65535, %v4117_v29  ;;  %v1387_v55 = vand.u32 65535, %v4123_v58  ;;  %v1429_v29 = vand.u32 65535, %v4133_v54  ;;  %v1415_v58 = vand.u32 65535, %v4139_v33 }
 0x22d   : > { %v1333_v62 = vcvt.s32.f32 %v1331_v16  ;;  %v1375_v24 = vcvt.s32.f32 %v1373_v61  ;;  %v1457_v54 = vand.u32 65535, %v4149_v12  ;;  %v1443_v33 = vand.u32 65535, %v4155_v23 }
 0x22e   : > { %v1389_v16 = vcvt.s32.f32 %v1387_v55  ;;  %v1417_v61 = vcvt.s32.f32 %v1415_v58  ;;  %v1485_v12 = vand.u32 65535, %v4165_v14  ;;  %v1471_v23 = vand.u32 65535, %v4171_v46 }
 0x22f   : > { %v1513_v14 = vand.u32 65535, %v4181_v50  ;;  %v1499_v46 = vand.u32 65535, %v4188_v2  ;;  %v1541_v50 = vand.u32 65535, %v4199_v17  ;;  %v1527_v2 = vand.u32 65535, %v4204_v56 }
 0x230   : > { %v1473_v55 = vcvt.s32.f32 %v1471_v23  ;;  %v1569_v17 = vand.u32 65535, %v4215_v43  ;;  %v1555_v56 = vand.u32 65535, %v4220_v0  ;;  %v1597_v43 = vand.u32 65535, %v4231_v10 }
 0x231   : > { %v1543_v58 = vcvt.s32.f32 %v1541_v50  ;;  %v1583_v0 = vand.u32 65535, %v4236_v42  ;;  %v1625_v10 = vand.u32 65535, %v4247_v5  ;;  %v1611_v42 = vand.u32 65535, %v4252_v49 }
 0x232   : > { %v1599_v23 = vcvt.s32.f32 %v1597_v43  ;;  %v1653_v5 = vand.u32 65535, %v4263_v30  ;;  %v1639_v49 = vand.u32 65535, %v4268_v41  ;;  %v1681_v30 = vand.u32 65535, %v4279_v51 }
 0x233   : > { %v1613_v50 = vcvt.s32.f32 %v1611_v42 }
 0x234   : > { %v1683_v43 = vcvt.s32.f32 %v1681_v30  ;;  %v4930_v30 = vld [vmem:[#allocation12_spill] sm:$0xff] }
 0x27c   : > { %v4298_v26 = vpop.xlane.xlu1 %1265 }
 0x27d   : > { %vm1267_vm0 = vcmp.eq.f32.partialorder %v4050_v39, %v4298_v26  ;;  %v4303_v8 = vpop.xlane.xlu0 %1251 }
 0x27e   : > { %vm1253_vm1 = vcmp.eq.f32.partialorder %v4056_v25, %v4303_v8  ;;  %v1268_v15 = vsel %vm1267_vm0, %v1263_v32, inf }
 0x27f   : > { %1269 = vmin.xlane.f32.xlu1 %v1268_v15  ;;  %v1254_v34 = vsel %vm1253_vm1, %v1249_v31, inf }
 0x280   : > { %v4308_v4 = vpop.xlane.xlu1 %1293  ;;  %1255 = vmin.xlane.f32.xlu0 %v1254_v34  ;;  %v1347_v34 = vcvt.s32.f32 %v1345_v37  ;;  %v1403_v37 = vcvt.s32.f32 %v1401_v13  ;;  %v1487_v13 = vcvt.s32.f32 %v1485_v12 }
 0x281   : > { %vm1295_vm15 = vcmp.eq.f32.partialorder %v4066_v27, %v4308_v4  ;;  %v4313_v39 = vpop.xlane.xlu0 %1279 }
 0x282   : > { %vm1281_vm14 = vcmp.eq.f32.partialorder %v4072_v57, %v4313_v39  ;;  %v1296_v25 = vsel %vm1295_vm15, %v1291_v63, inf }
 0x283   : > { %1297 = vmin.xlane.f32.xlu1 %v1296_v25  ;;  %v1282_v31 = vsel %vm1281_vm14, %v1277_v45, inf }
 0x284   : > { %v4318_v32 = vpop.xlane.xlu1 %1321  ;;  %1283 = vmin.xlane.f32.xlu0 %v1282_v31  ;;  %v1361_v31 = vcvt.s32.f32 %v1359_v38  ;;  %v1459_v38 = vcvt.s32.f32 %v1457_v54 }
 0x285   : > { %vm1323_vm0 = vcmp.eq.f32.partialorder %v4082_v7, %v4318_v32  ;;  %v4323_v27 = vpop.xlane.xlu0 %1307 }
 0x286   : > { %vm1309_vm1 = vcmp.eq.f32.partialorder %v4088_v21, %v4323_v27  ;;  %v1324_v57 = vsel %vm1323_vm0, %v1319_v35, inf }
 0x287   : > { %1325 = vmin.xlane.f32.xlu1 %v1324_v57  ;;  %v1310_v15 = vsel %vm1309_vm1, %v1305_v59, inf }
 0x288   : > { %v4328_v63 = vpop.xlane.xlu1 %1349  ;;  %1311 = vmin.xlane.f32.xlu0 %v1310_v15  ;;  %v1431_v15 = vcvt.s32.f32 %v1429_v29  ;;  %v1501_v29 = vcvt.s32.f32 %v1499_v46 }
 0x289   : > { %vm1351_vm14 = vcmp.eq.f32.partialorder %v4098_v1, %v4328_v63  ;;  %v4333_v7 = vpop.xlane.xlu0 %1335 }
 0x28a   : > { %vm1337_vm15 = vcmp.eq.f32.partialorder %v4104_v19, %v4333_v7  ;;  %v1352_v21 = vsel %vm1351_vm14, %v1347_v34, inf }
 0x28b   : > { %1353 = vmin.xlane.f32.xlu1 %v1352_v21  ;;  %v1338_v45 = vsel %vm1337_vm15, %v1333_v62, inf }
 0x28c   : > { %v4338_v25 = vpop.xlane.xlu1 %1377  ;;  %1339 = vmin.xlane.f32.xlu0 %v1338_v45  ;;  %v1445_v45 = vcvt.s32.f32 %v1443_v33 }
 0x28d   : > { %vm1379_vm0 = vcmp.eq.f32.partialorder %v4114_v18, %v4338_v25  ;;  %v4343_v1 = vpop.xlane.xlu0 %1363 }
 0x28e   : > { %vm1365_vm1 = vcmp.eq.f32.partialorder %v4120_v9, %v4343_v1  ;;  %v1380_v19 = vsel %vm1379_vm0, %v1375_v24, inf }
 0x28f   : > { %1381 = vmin.xlane.f32.xlu1 %v1380_v19  ;;  %v1366_v35 = vsel %vm1365_vm1, %v1361_v31, inf }
 0x290   : > { %v4348_v59 = vpop.xlane.xlu1 %1405  ;;  %1367 = vmin.xlane.f32.xlu0 %v1366_v35  ;;  %v1515_v35 = vcvt.s32.f32 %v1513_v14 }
 0x291   : > { %vm1407_vm14 = vcmp.eq.f32.partialorder %v4130_v44, %v4348_v59  ;;  %v4353_v18 = vpop.xlane.xlu0 %1391 }
 0x292   : > { %vm1393_vm15 = vcmp.eq.f32.partialorder %v4136_v53, %v4353_v18  ;;  %v1408_v9 = vsel %vm1407_vm14, %v1403_v37, inf }
 0x293   : > { %1409 = vmin.xlane.f32.xlu1 %v1408_v9  ;;  %v1394_v57 = vsel %vm1393_vm15, %v1389_v16, inf }
 0x294   : > { %v4358_v34 = vpop.xlane.xlu1 %1433  ;;  %1395 = vmin.xlane.f32.xlu0 %v1394_v57  ;;  %v1529_v57 = vcvt.s32.f32 %v1527_v2 }
 0x295   : > { %vm1435_vm0 = vcmp.eq.f32.partialorder %v4146_v20, %v4358_v34  ;;  %v4363_v44 = vpop.xlane.xlu0 %1419 }
 0x296   : > { %vm1421_vm1 = vcmp.eq.f32.partialorder %v4152_v52, %v4363_v44  ;;  %v1436_v53 = vsel %vm1435_vm0, %v1431_v15, inf  ;;  %v4919_v15 = vld [vmem:[#allocation28_spill] sm:$0xff] }
 0x297   : > { %1437 = vmin.xlane.f32.xlu1 %v1436_v53  ;;  %v1422_v62 = vsel %vm1421_vm1, %v1417_v61, inf  ;;  %v1571_v61 = vcvt.s32.f32 %v1569_v17  ;;  %v1557_v53 = vcvt.s32.f32 %v1555_v56  ;;  %v4925_v56 = vld [vmem:[#allocation36_spill] sm:$0xff] }
 0x298   : > { %v4368_v21 = vpop.xlane.xlu1 %1461  ;;  %1423 = vmin.xlane.f32.xlu0 %v1422_v62  ;;  %v4920_v62 = vld [vmem:[#allocation29_spill] sm:$0xff]  ;;  %v1667_v41 = vand.u32 65535, %v4925_v56  ;;  %v3205_v56 = vmov 1.0  }
 0x299   : > { %vm1463_vm14 = vcmp.eq.f32.partialorder %v4162_v47, %v4368_v21  ;;  %v4373_v20 = vpop.xlane.xlu0 %1447 }
 0x29a   : > { %vm1449_vm15 = vcmp.eq.f32.partialorder %v4168_v40, %v4373_v20  ;;  %v1464_v52 = vsel %vm1463_vm14, %v1459_v38, inf  ;;  %v4921_v38 = vld [vmem:[#allocation30_spill] sm:$0xff]  ;;  %v1669_v51 = vcvt.s32.f32 %v1667_v41 }
 0x29b   : > { %1465 = vmin.xlane.f32.xlu1 %v1464_v52  ;;  %v1450_v24 = vsel %vm1449_vm15, %v1445_v45, inf }
 0x29c   : > { %v4378_v31 = vpop.xlane.xlu1 %1489  ;;  %1451 = vmin.xlane.f32.xlu0 %v1450_v24  ;;  %v1585_v24 = vcvt.s32.f32 %v1583_v0 }
 0x29d   : > { %vm1491_vm0 = vcmp.eq.f32.partialorder %v4178_v60, %v4378_v31  ;;  %v4383_v47 = vpop.xlane.xlu0 %1475 }
 0x29e   : > { %vm1477_vm1 = vcmp.eq.f32.partialorder %v4184_v28, %v4383_v47  ;;  %v1492_v40 = vsel %vm1491_vm0, %v1487_v13, inf  ;;  %v4922_v13 = vld [vmem:[#allocation31_spill] sm:$0xff] }
 0x29f   : > { %1493 = vmin.xlane.f32.xlu1 %v1492_v40  ;;  %v1478_v19 = vsel %vm1477_vm1, %v1473_v55, inf  ;;  %v4923_v55 = vld [vmem:[#allocation32_spill] sm:$0xff] }
 0x2a0   : > { %v4388_v37 = vpop.xlane.xlu1 %1517  ;;  %1479 = vmin.xlane.f32.xlu0 %v1478_v19  ;;  %v1627_v19 = vcvt.s32.f32 %v1625_v10 }
 0x2a1   : > { %vm1519_vm14 = vcmp.eq.f32.partialorder %v4193_v11, %v4388_v37  ;;  %v4393_v60 = vpop.xlane.xlu0 %1503 }
 0x2a2   : > { %vm1505_vm15 = vcmp.eq.f32.partialorder %v4196_v48, %v4393_v60  ;;  %v1520_v28 = vsel %vm1519_vm14, %v1515_v35, inf }
 0x2a3   : > { %1521 = vmin.xlane.f32.xlu1 %v1520_v28  ;;  %v1506_v16 = vsel %vm1505_vm15, %v1501_v29, inf  ;;  %v4924_v29 = vld [vmem:[#allocation33_spill] sm:$0xff] }
 0x2a4   : > { %v4398_v9 = vpop.xlane.xlu1 %1545  ;;  %1507 = vmin.xlane.f32.xlu0 %v1506_v16 }
 0x2a5   : > { %vm1547_vm0 = vcmp.eq.f32.partialorder %v4209_v6, %v4398_v9  ;;  %v4403_v11 = vpop.xlane.xlu0 %1531 }
 0x2a6   : > { %vm1533_vm1 = vcmp.eq.f32.partialorder %v4919_v15, %v4403_v11  ;;  %v1548_v48 = vsel %vm1547_vm0, %v1543_v58, inf  ;;  %v1655_v58 = vcvt.s32.f32 %v1653_v5  ;;  %v4926_v15 = vld [vmem:[#allocation34_spill] sm:$0xff] }
 0x2a7   : > { %1549 = vmin.xlane.f32.xlu1 %v1548_v48  ;;  %v1534_v54 = vsel %vm1533_vm1, %v1529_v57, inf  ;;  %v1641_v57 = vcvt.s32.f32 %v1639_v49  ;;  %v4928_v49 = vld [vmem:[#allocation13_spill] sm:$0xff] }
 0x2a8   : > { %v4408_v33 = vpop.xlane.xlu1 %1573  ;;  %1535 = vmin.xlane.f32.xlu0 %v1534_v54  ;;  %v4927_v54 = vld [vmem:[#allocation35_spill] sm:$0xff] }
 0x2a9   : > { %vm1575_vm14 = vcmp.eq.f32.partialorder %v4920_v62, %v4408_v33  ;;  %v4413_v6 = vpop.xlane.xlu0 %1559 }
 0x2aa   : > { %vm1561_vm15 = vcmp.eq.f32.partialorder %v4921_v38, %v4413_v6  ;;  %v1576_v12 = vsel %vm1575_vm14, %v1571_v61, inf }
 0x2ab   : > { %1577 = vmin.xlane.f32.xlu1 %v1576_v12  ;;  %v1562_v45 = vsel %vm1561_vm15, %v1557_v53, inf  ;;  %v1272_v12 = vcvt.f32.s32 %v4298_v26  ;;  %v1314_v26 = vcvt.f32.s32 %v4323_v27 }
 0x2ac   : > { %v4418_v52 = vpop.xlane.xlu1 %1601  ;;  %1563 = vmin.xlane.f32.xlu0 %v1562_v45  ;;  %v1258_v45 = vcvt.f32.s32 %v4303_v8 }
 0x2ad   : > { %vm1603_vm0 = vcmp.eq.f32.partialorder %v4922_v13, %v4418_v52  ;;  %v4423_v14 = vpop.xlane.xlu0 %1587 }
 0x2ae   : > { %vm1589_vm1 = vcmp.eq.f32.partialorder %v4923_v55, %v4423_v14  ;;  %v1604_v46 = vsel %vm1603_vm0, %v1599_v23, inf  ;;  %v1300_v23 = vcvt.f32.s32 %v4308_v4  ;;  %v1286_v55 = vcvt.f32.s32 %v4313_v39 }
 0x2af   : > { %1605 = vmin.xlane.f32.xlu1 %v1604_v46  ;;  %v1590_v40 = vsel %vm1589_vm1, %v1585_v24, inf  ;;  %v1273_v24 = vshll.u32 %v1272_v12, 16 }
 0x2b0   : > { %v4428_v35 = vpop.xlane.xlu1 %1629  ;;  %1591 = vmin.xlane.f32.xlu0 %v1590_v40 }
 0x2b1   : > { %vm1631_vm14 = vcmp.eq.f32.partialorder %v4924_v29, %v4428_v35  ;;  %v4433_v2 = vpop.xlane.xlu0 %1615 }
 0x2b2   : > { %vm1617_vm15 = vcmp.eq.f32.partialorder %v4260_v36, %v4433_v2  ;;  %v1632_v28 = vsel %vm1631_vm14, %v1627_v19, inf }
 0x2b3   : > { %1633 = vmin.xlane.f32.xlu1 %v1632_v28  ;;  %v1618_v16 = vsel %vm1617_vm15, %v1613_v50, inf  ;;  %v1328_v50 = vcvt.f32.s32 %v4318_v32  ;;  %v1287_v28 = vshll.u32 %v1286_v55, 16  ;;  %v1356_v32 = vcvt.f32.s32 %v4328_v63 }
 0x2b4   : > { %v4438_v17 = vpop.xlane.xlu1 %1657  ;;  %1619 = vmin.xlane.f32.xlu0 %v1618_v16 }
 0x2b5   : > { %vm1659_vm0 = vcmp.eq.f32.partialorder %v4926_v15, %v4438_v17  ;;  %v4443_v48 = vpop.xlane.xlu0 %1643 }
 0x2b6   : > { %vm1645_vm1 = vcmp.eq.f32.partialorder %v4927_v54, %v4443_v48  ;;  %v1660_v36 = vsel %vm1659_vm0, %v1655_v58, inf  ;;  %v4929_v58 = vld [vmem:[#allocation11_spill] sm:$0xff]  ;;  %v1329_v54 = vshll.u32 %v1328_v50, 16 }
 0x2b7   : > { %1661 = vmin.xlane.f32.xlu1 %v1660_v36  ;;  %v1646_v61 = vsel %vm1645_vm1, %v1641_v57, inf  ;;  %v1315_v36 = vshll.u32 %v1314_v26, 16  ;;  %v4934_v26 = vld [vmem:[#allocation17_spill] sm:$0xff] }
 0x2b8   : > { %v4447_v53 = vpop.xlane.xlu1 %1685  ;;  %1647 = vmin.xlane.f32.xlu0 %v1646_v61 }
 0x2b9   : > { %vm1687_vm14 = vcmp.eq.f32.partialorder %v4289_v3, %v4447_v53  ;;  %v4451_v0 = vpop.xlane.xlu0 %1671  ;;  %v1259_v3 = vshll.u32 %v1258_v45, 16  ;;  %v4932_v45 = vld [vmem:[#allocation15_spill] sm:$0xff] }
 0x2ba   : > { %vm1673_vm15 = vcmp.eq.f32.partialorder %v4291_v22, %v4451_v0  ;;  %v1688_v62 = vsel %vm1687_vm14, %v1683_v43, inf  ;;  %v1301_v22 = vshll.u32 %v1300_v23, 16 }
 0x2bb   : > { %1689 = vmin.xlane.f32.xlu1 %v1688_v62  ;;  %v1674_v38 = vsel %vm1673_vm15, %v1669_v51, inf  ;;  %v1342_v51 = vcvt.f32.s32 %v4333_v7  ;;  %v4931_v62 = vld [vmem:[#allocation14_spill] sm:$0xff]  ;;  %v1384_v7 = vcvt.f32.s32 %v4338_v25  ;;  %v1412_v25 = vcvt.f32.s32 %v4348_v59  ;;  %v4936_v59 = vld [vmem:[#allocation19_spill] sm:$0xff] }
 0x2bc   : > { %1675 = vmin.xlane.f32.xlu0 %v1674_v38 }
 0x30c   : > { %v1270_v10 = vpop.xlane.xlu1 %1269 }
 0x30d   : > { %v1271_v42 = vcvt.f32.s32 %v1270_v10  ;;  %v1256_v13 = vpop.xlane.xlu0 %1255  ;;  %v1357_v10 = vshll.u32 %v1356_v32, 16 }
 0x30e   : > { %v1257_v46 = vcvt.f32.s32 %v1256_v13 }
 0x30f   : > { %v1274_v40 = vadd.s32 %v1273_v24, %v1271_v42 }
 0x310   : > { %v1298_v19 = vpop.xlane.xlu1 %1297  ;;  %v1260_v5 = vadd.s32 %v1259_v3, %v1257_v46  ;;  %v1370_v3 = vcvt.f32.s32 %v4343_v1 }
 0x311   : > { %v2055_v8 = vrot.slane %v1274_v40, %v4928_v49  ;;  %v1299_v29 = vcvt.f32.s32 %v1298_v19  ;;  %v1284_v4 = vpop.xlane.xlu0 %1283  ;;  %vm1696_vm1 = vcmp.eq.s32.totalorder %v4929_v58, %v1274_v40  ;;  %v4933_v19 = vld [vmem:[#allocation16_spill] sm:$0xff] }
 0x312   : > { %v1285_v16 = vcvt.f32.s32 %v1284_v4  ;;  %vm1695_vm0 = vcmp.eq.s32.totalorder %v4929_v58, %v1260_v5  ;;  %v2051_v57 = vrot.slane %v1260_v5, %v4930_v30 }
 0x313   : > { %v1302_v39 = vadd.s32 %v1301_v22, %v1299_v29  ;;  %2854 = vmatprep.mubr.msk.f32.mxu1 %vm1695_vm0, %v3205_v56  ;;  %v1343_v22 = vshll.u32 %v1342_v51, 16  ;;  %v1413_v51 = vshll.u32 %v1412_v25, 16 }
 0x314   : > { %v1288_v41 = vadd.s32 %v1287_v28, %v1285_v16  ;;  %v2056_v27 = vsel %vm940_vm2, %v2055_v8, %v2051_v57  ;;  %v1326_v15 = vpop.xlane.xlu1 %1325  ;;  %2855 = vmatmul.mubr.msk.f32.vlgmr.msra.gmra.mrb[0].mxu1 %vm1696_vm1, %v3205_v56  ;;  %v1385_v16 = vshll.u32 %v1384_v7, 16  ;;  %v1371_v57 = vshll.u32 %v1370_v3, 16  ;;  %v4937_v7 = vld [vmem:[#allocation20_spill] sm:$0xff] }
 0x315   : > { %v1327_v61 = vcvt.f32.s32 %v1326_v15  ;;  %v1312_v43 = vpop.xlane.xlu0 %1311  ;;  %v2065_v23 = vrot.slane %v1302_v39, %v4932_v45  ;;  %vm1698_vm15 = vcmp.eq.s32.totalorder %v4929_v58, %v1302_v39  ;;  %v4935_v15 = vld [vmem:[#allocation18_spill] sm:$0xff] }
 0x316   : > { %v2060_v38 = vrot.slane %v1288_v41, %v4931_v62  ;;  %v1313_v12 = vcvt.f32.s32 %v1312_v43  ;;  %vm1697_vm14 = vcmp.eq.s32.totalorder %v4929_v58, %v1288_v41 }
 0x317   : > { %v1330_v63 = vadd.s32 %v1329_v54, %v1327_v61  ;;  %2857 = vmatprep.mubr.msk.f32.mxu1 %vm1697_vm14, %v3205_v56 }
 0x318   : > { %v2061_v24 = vsel %vm947_vm3, %v2060_v38, %v2056_v27  ;;  %v1316_v42 = vadd.s32 %v1315_v36, %v1313_v12  ;;  %v1354_v13 = vpop.xlane.xlu1 %1353  ;;  %2858 = vmatmul.mubr.msk.f32.gmra.mrb[2].mxu1 %vm1698_vm15, %v3205_v56  ;;  %v1398_v27 = vcvt.f32.s32 %v4353_v18  ;;  %v1440_v18 = vcvt.f32.s32 %v4358_v34 }
 0x319   : > { %v2066_v55 = vsel %vm954_vm4, %v2065_v23, %v2061_v24  ;;  %v1355_v46 = vcvt.f32.s32 %v1354_v13  ;;  %v1340_v40 = vpop.xlane.xlu0 %1339  ;;  %v2075_v8 = vrot.slane %v1330_v63, %v4934_v26  ;;  %vm1700_vm1 = vcmp.eq.s32.totalorder %v4929_v58, %v1330_v63 }
 0x31a   : > { %v2070_v5 = vrot.slane %v1316_v42, %v4933_v19  ;;  %v1341_v50 = vcvt.f32.s32 %v1340_v40  ;;  %vm1699_vm0 = vcmp.eq.s32.totalorder %v4929_v58, %v1316_v42  ;;  %v1426_v63 = vcvt.f32.s32 %v4363_v44 }
 0x31b   : > { %v1358_v29 = vadd.s32 %v1357_v10, %v1355_v46  ;;  %2860 = vmatprep.mubr.msk.f32.mxu1 %vm1699_vm0, %v3205_v56  ;;  %v1399_v13 = vshll.u32 %v1398_v27, 16  ;;  %v4938_v46 = vld [vmem:[#allocation21_spill] sm:$0xff]  ;;  %v1468_v34 = vcvt.f32.s32 %v4368_v21  ;;  %v4940_v21 = vld [vmem:[#allocation23_spill] sm:$0xff] }
 0x31c   : > { %v2071_v1 = vsel %vm961_vm5, %v2070_v5, %v2066_v55  ;;  %v1344_v4 = vadd.s32 %v1343_v22, %v1341_v50  ;;  %v1382_v28 = vpop.xlane.xlu1 %1381  ;;  %2861 = vmatmul.mubr.msk.f32.gmra.mrb[4].mxu1 %vm1700_vm1, %v3205_v56 }
 0x31d   : > { %v2076_v39 = vsel %vm968_vm6, %v2075_v8, %v2071_v1  ;;  %v1383_v32 = vcvt.f32.s32 %v1382_v28  ;;  %v1368_v41 = vpop.xlane.xlu0 %1367  ;;  %v2085_v61 = vrot.slane %v1358_v29, %v4936_v59  ;;  %vm1702_vm15 = vcmp.eq.s32.totalorder %v4929_v58, %v1358_v29 }
 0x31e   : > { %v2080_v54 = vrot.slane %v1344_v4, %v4935_v15  ;;  %v1369_v36 = vcvt.f32.s32 %v1368_v41  ;;  %vm1701_vm14 = vcmp.eq.s32.totalorder %v4929_v58, %v1344_v4  ;;  %v1441_v8 = vshll.u32 %v1440_v18, 16  ;;  %v4941_v18 = vld [vmem:[#allocation24_spill] sm:$0xff] }
 0x31f   : > { %v1386_v43 = vadd.s32 %v1385_v16, %v1383_v32  ;;  %2863 = vmatprep.mubr.msk.f32.mxu1 %vm1701_vm14, %v3205_v56  ;;  %v1427_v29 = vshll.u32 %v1426_v63, 16  ;;  %v1454_v28 = vcvt.f32.s32 %v4373_v20  ;;  %v4939_v16 = vld [vmem:[#allocation22_spill] sm:$0xff]  ;;  %v1469_v27 = vshll.u32 %v1468_v34, 16 }
 0x320   : > { %v2081_v38 = vsel %vm975_vm7, %v2080_v54, %v2076_v39  ;;  %v1372_v12 = vadd.s32 %v1371_v57, %v1369_v36  ;;  %v1410_v23 = vpop.xlane.xlu1 %1409  ;;  %2864 = vmatmul.mubr.msk.f32.gmra.mrb[6].mxu1 %vm1702_vm15, %v3205_v56  ;;  %v1496_v20 = vcvt.f32.s32 %v4378_v31  ;;  %v1524_v31 = vcvt.f32.s32 %v4388_v37  ;;  %v4945_v37 = vld [vmem:[#allocation27_spill] sm:$0xff] }
 0x321   : > { %v2086_v10 = vsel %vm982_vm8, %v2085_v61, %v2081_v38  ;;  %v1411_v24 = vcvt.f32.s32 %v1410_v23  ;;  %v1396_v42 = vpop.xlane.xlu0 %1395  ;;  %v2095_v40 = vrot.slane %v1386_v43, %v4938_v46  ;;  %vm1704_vm1 = vcmp.eq.s32.totalorder %v4929_v58, %v1386_v43 }
 0x322   : > { %v2090_v3 = vrot.slane %v1372_v12, %v4937_v7  ;;  %v1397_v55 = vcvt.f32.s32 %v1396_v42  ;;  %vm1703_vm0 = vcmp.eq.s32.totalorder %v4929_v58, %v1372_v12  ;;  %v1482_v43 = vcvt.f32.s32 %v4383_v47 }
 0x323   : > { %v1414_v22 = vadd.s32 %v1413_v51, %v1411_v24  ;;  %2866 = vmatprep.mubr.msk.f32.mxu1 %vm1703_vm0, %v3205_v56  ;;  %v1455_v23 = vshll.u32 %v1454_v28, 16  ;;  %v4942_v24 = vld [vmem:[#allocation25_spill] sm:$0xff]  ;;  %v1525_v28 = vshll.u32 %v1524_v31, 16 }
 0x324   : > { %v2091_v44 = vsel %vm989_vm9, %v2090_v3, %v2086_v10  ;;  %v1400_v5 = vadd.s32 %v1399_v13, %v1397_v55  ;;  %v1438_v50 = vpop.xlane.xlu1 %1437  ;;  %2867 = vmatmul.mubr.msk.f32.gmra.mrb[8].mxu1 %vm1704_vm1, %v3205_v56 }
 0x325   : > { %v2096_v25 = vsel %vm996_vm10, %v2095_v40, %v2091_v44  ;;  %v1439_v1 = vcvt.f32.s32 %v1438_v50  ;;  %v1424_v4 = vpop.xlane.xlu0 %1423  ;;  %v2105_v32 = vrot.slane %v1414_v22, %v4940_v21  ;;  %vm1706_vm15 = vcmp.eq.s32.totalorder %v4929_v58, %v1414_v22 }
 0x326   : > { %v2100_v57 = vrot.slane %v1400_v5, %v4939_v16  ;;  %v1425_v39 = vcvt.f32.s32 %v1424_v4  ;;  %vm1705_vm14 = vcmp.eq.s32.totalorder %v4929_v58, %v1400_v5  ;;  %v1497_v40 = vshll.u32 %v1496_v20, 16 }
 0x327   : > { %v1442_v41 = vadd.s32 %v1441_v8, %v1439_v1  ;;  %2869 = vmatprep.mubr.msk.f32.mxu1 %vm1705_vm14, %v3205_v56  ;;  %v1483_v22 = vshll.u32 %v1482_v43, 16  ;;  %vm4943_vm14 = vcmask 917312   ;;  %v1510_v50 = vcvt.f32.s32 %v4393_v60  ;;  %v4944_v8 = vld [vmem:[#allocation26_spill] sm:$0xff] }
 0x328   : > { %v2101_v54 = vsel %vm1003_vm11, %v2100_v57, %v2096_v25  ;;  %v1428_v36 = vadd.s32 %v1427_v29, %v1425_v39  ;;  %v1466_v61 = vpop.xlane.xlu1 %1465  ;;  %2870 = vmatmul.mubr.msk.f32.gmra.mrb[10].mxu1 %vm1706_vm15, %v3205_v56  ;;  %v1552_v57 = vcvt.f32.s32 %v4398_v9  ;;  %v1538_v60 = vcvt.f32.s32 %v4403_v11 }
 0x329   : > { %v2106_v51 = vsel %vm1010_vm12, %v2105_v32, %v2101_v54  ;;  %v1467_v38 = vcvt.f32.s32 %v1466_v61  ;;  %v1452_v12 = vpop.xlane.xlu0 %1451  ;;  %v2115_v42 = vrot.slane %v1442_v41, %v4942_v24  ;;  %vm1708_vm1 = vcmp.eq.s32.totalorder %v4929_v58, %v1442_v41 }
 0x32a   : > { %v2110_v63 = vrot.slane %v1428_v36, %v4941_v18  ;;  %v1453_v10 = vcvt.f32.s32 %v1452_v12  ;;  %vm1707_vm0 = vcmp.eq.s32.totalorder %v4929_v58, %v1428_v36  ;;  %v1511_v20 = vshll.u32 %v1510_v50, 16 }
 0x32b   : > { %v1470_v13 = vadd.s32 %v1469_v27, %v1467_v38  ;;  %2872 = vmatprep.mubr.msk.f32.mxu1 %vm1707_vm0, %v3205_v56  ;;  %v1553_v12 = vshll.u32 %v1552_v57, 16 }
 0x32c   : > { %v2111_v47 = vsel %vm1017_vm13, %v2110_v63, %v2106_v51  ;;  %v1456_v3 = vadd.s32 %v1455_v23, %v1453_v10  ;;  %v1494_v55 = vpop.xlane.xlu1 %1493  ;;  %2873 = vmatmul.mubr.msk.f32.gmra.mrb[12].mxu1 %vm1708_vm1, %v3205_v56  ;;  %vm4946_vm1 = vcmask 982912   ;;  %v1539_v23 = vshll.u32 %v1538_v60, 16 }
 0x32d   : > { %v2116_v34 = vsel %vm4943_vm14, %v2115_v42, %v2111_v47  ;;  %v1495_v44 = vcvt.f32.s32 %v1494_v55  ;;  %v1480_v5 = vpop.xlane.xlu0 %1479  ;;  %v2125_v1 = vrot.slane %v1470_v13, %v4945_v37  ;;  %vm1710_vm0 = vcmp.eq.s32.totalorder %v4929_v58, %v1470_v13 }
 0x32e   : > { %v2120_v29 = vrot.slane %v1456_v3, %v4944_v8  ;;  %v1481_v25 = vcvt.f32.s32 %v1480_v5  ;;  %vm1709_vm15 = vcmp.eq.s32.totalorder %v4929_v58, %v1456_v3  ;;  %vm4947_vm14 = vcmask 1048512  }
 0x32f   : > { %v1498_v4 = vadd.s32 %v1497_v40, %v1495_v44  ;;  %2875 = vmatprep.mubr.msk.f32.mxu1 %vm1709_vm15, %v3205_v56  ;;  %v1580_v63 = vcvt.f32.s32 %v4408_v33  ;;  %v1566_v42 = vcvt.f32.s32 %v4413_v6  ;;  %v1608_v55 = vcvt.f32.s32 %v4418_v52 }
 0x330   : > { %v2121_v39 = vsel %vm4946_vm1, %v2120_v29, %v2116_v34  ;;  %v1484_v32 = vadd.s32 %v1483_v22, %v1481_v25  ;;  %v1522_v41 = vpop.xlane.xlu1 %1521  ;;  %2876 = vmatmul.mubr.msk.f32.gmra.mrb[14].mxu1 %vm1710_vm0, %v3205_v56 }
 0x331   : > { %v2134_v27 = vrot.slane %v1498_v4, %v4928_v49  ;;  %v1523_v54 = vcvt.f32.s32 %v1522_v41  ;;  %v1508_v36 = vpop.xlane.xlu0 %1507  ;;  %v4541_v61 = vsel %vm4947_vm14, %v2125_v1, %v2121_v39  ;;  %vm1712_vm0 = vcmp.eq.s32.totalorder %v4929_v58, %v1498_v4 }
 0x332   : > { %v2130_v43 = vrot.slane %v1484_v32, %v4930_v30  ;;  %v1509_v51 = vcvt.f32.s32 %v1508_v36  ;;  %vm1711_vm15 = vcmp.eq.s32.totalorder %v4929_v58, %v1484_v32  ;;  %v1581_v6 = vshll.u32 %v1580_v63, 16 }
 0x333   : > { %v1526_v9 = vadd.s32 %v1525_v28, %v1523_v54  ;;  %2878 = vmatprep.mubr.msk.f32.mxu1 %vm1711_vm15, %v3205_v56  ;;  %v1567_v5 = vshll.u32 %v1566_v42, 16  ;;  %v1609_v1 = vshll.u32 %v1608_v55, 16 }
 0x334   : > { %v2135_v11 = vsel %vm940_vm2, %v2134_v27, %v2130_v43  ;;  %v1512_v38 = vadd.s32 %v1511_v20, %v1509_v51  ;;  %v1550_v49 = vpop.xlane.xlu1 %1549  ;;  %2879 = vmatmul.mubr.msk.f32.gmra.mrb[16].mxu1 %vm1712_vm0, %v3205_v56 }
 0x335   : > { %v1551_v10 = vcvt.f32.s32 %v1550_v49  ;;  %v1536_v30 = vpop.xlane.xlu0 %1535  ;;  %v2144_v47 = vrot.slane %v1526_v9, %v4932_v45  ;;  %vm1714_vm2 = vcmp.eq.s32.totalorder %v4929_v58, %v1526_v9 }
 0x336   : > { %v2139_v13 = vrot.slane %v1512_v38, %v4931_v62  ;;  %v1537_v31 = vcvt.f32.s32 %v1536_v30  ;;  %vm1713_vm1 = vcmp.eq.s32.totalorder %v4929_v58, %v1512_v38  ;;  %v1594_v62 = vcvt.f32.s32 %v4423_v14 }
 0x337   : > { %v1554_v3 = vadd.s32 %v1553_v12, %v1551_v10  ;;  %2881 = vmatprep.mubr.msk.f32.mxu1 %vm1713_vm1, %v3205_v56  ;;  %vm4949_vm1 = vcmask 982912  }
 0x338   : > { %v2140_v33 = vsel %vm947_vm3, %v2139_v13, %v2135_v11  ;;  %v1540_v40 = vadd.s32 %v1539_v23, %v1537_v31  ;;  %v1578_v22 = vpop.xlane.xlu1 %1577  ;;  %2882 = vmatmul.mubr.msk.f32.gmra.mrb[18].mxu1 %vm1714_vm2, %v3205_v56  ;;  %v1595_v57 = vshll.u32 %v1594_v62, 16  ;;  %vm4950_vm2 = vcmask 1048512  }
 0x339   : > { %v2145_v34 = vsel %vm954_vm4, %v2144_v47, %v2140_v33  ;;  %v1579_v44 = vcvt.f32.s32 %v1578_v22  ;;  %v1564_v45 = vpop.xlane.xlu0 %1563  ;;  %v2154_v52 = vrot.slane %v1554_v3, %v4934_v26  ;;  %vm1716_vm3 = vcmp.eq.s32.totalorder %v4929_v58, %v1554_v3 }
 0x33a   : > { %v2149_v50 = vrot.slane %v1540_v40, %v4933_v19  ;;  %v1565_v29 = vcvt.f32.s32 %v1564_v45  ;;  %vm1715_vm14 = vcmp.eq.s32.totalorder %v4929_v58, %v1540_v40  ;;  %v1636_v19 = vcvt.f32.s32 %v4428_v35 }
 0x33b   : > { %v1582_v25 = vadd.s32 %v1581_v6, %v1579_v44  ;;  %2884 = vmatprep.mubr.msk.f32.mxu1 %vm1715_vm14, %v3205_v56  ;;  %v1622_v26 = vcvt.f32.s32 %v4433_v2  ;;  %v1664_v35 = vcvt.f32.s32 %v4438_v17  ;;  %vm4951_vm14 = vcmask 261120  }
 0x33c   : > { %v2150_v14 = vsel %vm961_vm5, %v2149_v50, %v2145_v34  ;;  %v1568_v4 = vadd.s32 %v1567_v5, %v1565_v29  ;;  %v1606_v28 = vpop.xlane.xlu1 %1605  ;;  %2885 = vmatmul.mubr.msk.f32.gmra.mrb[20].mxu1 %vm1716_vm3, %v3205_v56  ;;  %v1637_v2 = vshll.u32 %v1636_v19, 16  ;;  %vm4952_vm3 = vmmov %vm4951_vm14 }
 0x33d   : > { %v2155_v39 = vsel %vm968_vm6, %v2154_v52, %v2150_v14  ;;  %v1607_v32 = vcvt.f32.s32 %v1606_v28  ;;  %v1592_v41 = vpop.xlane.xlu0 %1591  ;;  %v2164_v54 = vrot.slane %v1582_v25, %v4936_v59  ;;  %vm1718_vm5 = vcmp.eq.s32.totalorder %v4929_v58, %v1582_v25 }
 0x33e   : > { %v2159_v60 = vrot.slane %v1568_v4, %v4935_v15  ;;  %v1593_v27 = vcvt.f32.s32 %v1592_v41  ;;  %vm1717_vm4 = vcmp.eq.s32.totalorder %v4929_v58, %v1568_v4  ;;  %v1650_v15 = vcvt.f32.s32 %v4443_v48  ;;  %v3042_v41 = vld [vmem:[%s3345_s22 + $0x18] sm:$0xff] }
 0x33f   : > { %v1610_v36 = vadd.s32 %v1609_v1, %v1607_v32  ;;  %2887 = vmatprep.mubr.msk.f32.mxu1 %vm1717_vm4, %v3205_v56  ;;  %v1623_v38 = vshll.u32 %v1622_v26, 16  ;;  %v1665_v63 = vshll.u32 %v1664_v35, 16  ;;  %vm4953_vm4 = vmmov %vm4952_vm3 }
 0x340   : > { %v2160_v20 = vsel %vm975_vm7, %v2159_v60, %v2155_v39  ;;  %v1596_v43 = vadd.s32 %v1595_v57, %v1593_v27  ;;  %v1634_v51 = vpop.xlane.xlu1 %1633  ;;  %2888 = vmatmul.mubr.msk.f32.gmra.mrb[22].mxu1 %vm1718_vm5, %v3205_v56  ;;  %v1651_v42 = vshll.u32 %v1650_v15, 16  ;;  %vm4954_vm5 = vmmov %vm4952_vm3 }
 0x341   : > { %v2165_v9 = vsel %vm982_vm8, %v2164_v54, %v2160_v20  ;;  %v1635_v11 = vcvt.f32.s32 %v1634_v51  ;;  %v1620_v59 = vpop.xlane.xlu0 %1619  ;;  %v2174_v17 = vrot.slane %v1610_v36, %v4938_v46  ;;  %vm1720_vm7 = vcmp.eq.s32.totalorder %v4929_v58, %v1610_v36  ;;  %v3043_v54 = vld [vmem:[%s3345_s22 + $0x10] sm:$0xff] }
 0x342   : > { %v2169_v49 = vrot.slane %v1596_v43, %v4937_v7  ;;  %v1621_v12 = vcvt.f32.s32 %v1620_v59  ;;  %vm1719_vm6 = vcmp.eq.s32.totalorder %v4929_v58, %v1596_v43  ;;  %v1692_v7 = vcvt.f32.s32 %v4447_v53  ;;  %v3045_v59 = vld [vmem:[%s3345_s22 + $0x20] sm:$0xff] }
 0x343   : > { %v1638_v23 = vadd.s32 %v1637_v2, %v1635_v11  ;;  %2890 = vmatprep.mubr.msk.f32.mxu1 %vm1719_vm6, %v3205_v56  ;;  %v1678_v46 = vcvt.f32.s32 %v4451_v0  ;;  %vm4955_vm6 = vmmov %vm4952_vm3  ;;  %v3044_v2 = vld [vmem:[%s3345_s22 + $0x28] sm:$0xff] }
 0x344   : > { %v2170_v48 = vsel %vm989_vm9, %v2169_v49, %v2165_v9  ;;  %v1624_v10 = vadd.s32 %v1623_v38, %v1621_v12  ;;  %v1662_v30 = vpop.xlane.xlu1 %1661  ;;  %2891 = vmatmul.mubr.msk.f32.gmra.mrb[24].mxu1 %vm1720_vm7, %v3205_v56  ;;  %v1693_v62 = vshll.u32 %v1692_v7, 16  ;;  %vm4956_vm7 = vmmov %vm4952_vm3 }
 0x345   : > { %v2175_v13 = vsel %vm996_vm10, %v2174_v17, %v2170_v48  ;;  %v1663_v31 = vcvt.f32.s32 %v1662_v30  ;;  %v1648_v47 = vpop.xlane.xlu0 %1647  ;;  %v2184_v33 = vrot.slane %v1638_v23, %v4940_v21  ;;  %vm1722_vm9 = vcmp.eq.s32.totalorder %v4929_v58, %v1638_v23 }
 0x346   : > { %v2179_v3 = vrot.slane %v1624_v10, %v4939_v16  ;;  %v1649_v55 = vcvt.f32.s32 %v1648_v47  ;;  %vm1721_vm8 = vcmp.eq.s32.totalorder %v4929_v58, %v1624_v10  ;;  %v1679_v44 = vshll.u32 %v1678_v46, 16  ;;  %v3046_v10 = vld [vmem:[%s3345_s22 + $0x38] sm:$0xff] }
 0x347   : > { %v1666_v40 = vadd.s32 %v1665_v63, %v1663_v31  ;;  %2893 = vmatprep.mubr.msk.f32.mxu1 %vm1721_vm8, %v3205_v56  ;;  %vm4957_vm8 = vmmov %vm4952_vm3 }
 0x348   : > { %v2180_v53 = vsel %vm1003_vm11, %v2179_v3, %v2175_v13  ;;  %v1652_v22 = vadd.s32 %v1651_v42, %v1649_v55  ;;  %v1690_v6 = vpop.xlane.xlu1 %1689  ;;  %2894 = vmatmul.mubr.msk.f32.gmra.mrb[26].mxu1 %vm1722_vm9, %v3205_v56  ;;  %vm4958_vm9 = vmmov %vm4952_vm3  ;;  %v3047_v13 = vld [vmem:[%s3345_s22 + $0x30] sm:$0xff] }
 0x349   : > { %v2185_v0 = vsel %vm1010_vm12, %v2184_v33, %v2180_v53  ;;  %v1691_v16 = vcvt.f32.s32 %v1690_v6  ;;  %v1676_v34 = vpop.xlane.xlu0 %1675  ;;  %v2194_v5 = vrot.slane %v1666_v40, %v4942_v24  ;;  %vm1724_vm11 = vcmp.eq.s32.totalorder %v4929_v58, %v1666_v40  ;;  %v3048_v53 = vld [vmem:[%s3345_s22 + $0x48] sm:$0xff] }
 0x34a   : > { %v2189_v21 = vrot.slane %v1652_v22, %v4941_v18  ;;  %v1677_v45 = vcvt.f32.s32 %v1676_v34  ;;  %vm1723_vm10 = vcmp.eq.s32.totalorder %v4929_v58, %v1652_v22  ;;  %vm4948_vm12 = vcmask 917312  }
 0x34b   : > { %v1694_v50 = vadd.s32 %v1693_v62, %v1691_v16  ;;  %2896 = vmatprep.mubr.msk.f32.mxu1 %vm1723_vm10, %v3205_v56  ;;  %vm4959_vm10 = vmmov %vm4952_vm3 }
 0x34c   : > { %v2190_v29 = vsel %vm1017_vm13, %v2189_v21, %v2185_v0  ;;  %v1680_v52 = vadd.s32 %v1679_v44, %v1677_v45  ;;  %2897 = vmatmul.mubr.msk.f32.gmra.mrb[28].mxu1 %vm1724_vm11, %v3205_v56  ;;  %vm1040_vm13 = vcmask 1041409   ;;  %vm4960_vm11 = vmmov %vm4952_vm3  ;;  %v3049_v0 = vld [vmem:[%s3345_s22 + $0x40] sm:$0xff] }
 0x34d   : > { %v2195_v25 = vsel %vm4948_vm12, %v2194_v5, %v2190_v29  ;;  %v2204_v24 = vrot.slane %v1694_v50, %v4945_v37  ;;  %vm1726_vm0 = vcmp.eq.s32.totalorder %v4929_v58, %v1694_v50  ;;  %vm4961_vm12 = vmmov %vm4952_vm3  ;;  %v3050_v29 = vld [vmem:[%s3345_s22 + $0x58] sm:$0xff] }
 0x34e   : > { %v2199_v18 = vrot.slane %v1680_v52, %v4944_v8  ;;  %vm1725_vm15 = vcmp.eq.s32.totalorder %v4929_v58, %v1680_v52  ;;  %v3040_v58 = vld [vmem:[%s3345_s22 + $0x8] sm:$0xff] }
 0x34f   : > { %2899 = vmatprep.mubr.msk.f32.mxu1 %vm1725_vm15, %v3205_v56  ;;  %vm4962_vm15 = vmmov %vm4952_vm3 }
 0x350   : > { %v2200_v1 = vsel %vm4949_vm1, %v2199_v18, %v2195_v25  ;;  %2900 = vmatmul.mubr.msk.f32.gmra.mrb[30].mxu1 %vm1726_vm0, %v3205_v56  ;;  %vm4963_vm0 = vmmov %vm4952_vm3 }
 0x351   : > { %v2205_v14 = vsel %vm4950_vm2, %v2204_v24, %v2200_v1  ;;  %vm4965_vm1 = vmmov %vm4963_vm0  ;;  %v3051_v24 = vld [vmem:[%s3345_s22 + $0x50] sm:$0xff] }
 0x352   : > { %v2206_v4 = vsel %vm1040_vm13, %v2205_v14, %v4541_v61  ;;  %v3041_v61 = vld [vmem:[%s3345_s22] sm:$0xff]  ;;  %vm4964_vm13 = vmmov %vm4963_vm0 }
 0x353   : > { %2207 = vst [vmem:[%s4617_s25] sm:$0x3] %v2206_v4  ;;  %vm4966_vm2 = vmmov %vm4963_vm0 }
 0x3e7   : > { %v2856_v8 = vpop.f32.mrb[0].mxu1 }
 0x3e8   : > { %2017 = vst.msk [vmem:[%s4622_s26 + $0x8] sm:$0xff] %vm4951_vm14, %v2856_v8  ;;  %v2209_v56 = vsub.f32 %v2856_v8, %v3040_v58  ;;  %v1857_v37 = vpop.f32.mrb[1].mxu1  ;;  %vm4967_vm14 = vmmov %vm4963_vm0 }
 0x3e9   : > { %2016 = vst.msk [vmem:[%s4622_s26] sm:$0xff] %vm4952_vm3, %v1857_v37  ;;  %v2208_v28 = vsub.f32 %v1857_v37, %v3041_v61  ;;  %vm4968_vm3 = vmmov %vm4963_vm0  ;;  %v3052_v61 = vld [vmem:[%s3345_s22 + $0x68] sm:$0xff] }
 0x3ea   : > { %v2241_v57 = vmul.f32 %v2209_v56, %v2209_v56 }
 0x3eb   : > { %v2240_v19 = vmul.f32 %v2208_v28, %v2208_v28  ;;  %v2859_v39 = vpop.f32.mrb[2].mxu1 }
 0x3ec   : > { %v2273_v32 = vsel %vm4953_vm4, %v2241_v57, 0.0  ;;  %2019 = vst.msk [vmem:[%s4622_s26 + $0x18] sm:$0xff] %vm4954_vm5, %v2859_v39  ;;  %v2211_v26 = vsub.f32 %v2859_v39, %v3042_v41  ;;  %v1867_v60 = vpop.f32.mrb[3].mxu1  ;;  %vm4969_vm4 = vmmov %vm4963_vm0  ;;  %v3053_v39 = vld [vmem:[%s3345_s22 + $0x60] sm:$0xff] }
 0x3ed   : > { %v2272_v27 = vsel %vm4955_vm6, %v2240_v19, 0.0  ;;  %2018 = vst.msk [vmem:[%s4622_s26 + $0x10] sm:$0xff] %vm4956_vm7, %v1867_v60  ;;  %v2210_v36 = vsub.f32 %v1867_v60, %v3043_v54  ;;  %vm4970_vm5 = vmmov %vm4963_vm0 }
 0x3ee   : > { %v2274_v35 = vadd.f32 %v2273_v32, %v2272_v27  ;;  %v2243_v20 = vmul.f32 %v2211_v26, %v2211_v26  ;;  %vm4971_vm6 = vmmov %vm4963_vm0 }
 0x3ef   : > { %v2242_v43 = vmul.f32 %v2210_v36, %v2210_v36  ;;  %v2862_v51 = vpop.f32.mrb[4].mxu1  ;;  %vm4972_vm7 = vmmov %vm4963_vm0 }
 0x3f0   : > { %2021 = vst.msk [vmem:[%s4622_s26 + $0x28] sm:$0xff] %vm4957_vm8, %v2862_v51  ;;  %v2213_v15 = vsub.f32 %v2862_v51, %v3044_v2  ;;  %v1877_v9 = vpop.f32.mrb[5].mxu1  ;;  %v2277_v12 = vsel %vm4960_vm11, %v2243_v20, 0.0  ;;  %vm4973_vm8 = vmmov %vm4963_vm0  ;;  %v3055_v2 = vld [vmem:[%s3345_s22 + $0x70] sm:$0xff] }
 0x3f1   : > { %v2275_v11 = vsel %vm4958_vm9, %v2242_v43, 0.0  ;;  %2020 = vst.msk [vmem:[%s4622_s26 + $0x20] sm:$0xff] %vm4959_vm10, %v1877_v9  ;;  %v2212_v38 = vsub.f32 %v1877_v9, %v3045_v59  ;;  %vm4974_vm9 = vmmov %vm4963_vm0 }
 0x3f2   : > { %v2276_v49 = vadd.f32 %v2275_v11, %v2274_v35  ;;  %v2245_v17 = vmul.f32 %v2213_v15, %v2213_v15  ;;  %vm4975_vm10 = vmmov %vm4963_vm0  ;;  %v3054_v35 = vld [vmem:[%s3345_s22 + $0x78] sm:$0xff] }
 0x3f3   : > { %v2244_v23 = vmul.f32 %v2212_v38, %v2212_v38  ;;  %v2865_v63 = vpop.f32.mrb[6].mxu1  ;;  %vm4976_vm11 = vmmov %vm4963_vm0 }
 0x3f4   : > { %v2278_v48 = vadd.f32 %v2277_v12, %v2276_v49  ;;  %2023 = vst.msk [vmem:[%s4622_s26 + $0x38] sm:$0xff] %vm4961_vm12, %v2865_v63  ;;  %v2215_v30 = vsub.f32 %v2865_v63, %v3046_v10  ;;  %v1887_v42 = vpop.f32.mrb[7].mxu1  ;;  %v2281_v46 = vsel %vm4964_vm13, %v2245_v17, 0.0  ;;  %vm4977_vm12 = vmmov %vm4963_vm0  ;;  %v3056_v17 = vld [vmem:[%s3345_s22 + $0x88] sm:$0xff]  ;;  %v3057_v10 = vld [vmem:[%s3345_s22 + $0x80] sm:$0xff] }
 0x3f5   : > { %v2279_v7 = vsel %vm4962_vm15, %v2244_v23, 0.0  ;;  %2022 = vst.msk [vmem:[%s4622_s26 + $0x30] sm:$0xff] %vm4963_vm0, %v1887_v42  ;;  %v2214_v31 = vsub.f32 %v1887_v42, %v3047_v13  ;;  %vm4978_vm15 = vmmov %vm4963_vm0 }
 0x3f6   : > { %v2280_v47 = vadd.f32 %v2279_v7, %v2278_v48  ;;  %v2247_v3 = vmul.f32 %v2215_v30, %v2215_v30  ;;  %vm4979_vm13 = vmmov %vm4963_vm0 }
 0x3f7   : > { %v2246_v55 = vmul.f32 %v2214_v31, %v2214_v31  ;;  %v2868_v33 = vpop.f32.mrb[8].mxu1 }
 0x3f8   : > { %v2282_v40 = vadd.f32 %v2281_v46, %v2280_v47  ;;  %2025 = vst.msk [vmem:[%s4622_s26 + $0x48] sm:$0xff] %vm4965_vm1, %v2868_v33  ;;  %v2217_v22 = vsub.f32 %v2868_v33, %v3048_v53  ;;  %v1897_v6 = vpop.f32.mrb[9].mxu1  ;;  %v2285_v44 = vsel %vm4968_vm3, %v2247_v3, 0.0  ;;  %vm4980_vm1 = vmmov %vm4963_vm0  ;;  %v3058_v3 = vld [vmem:[%s3345_s22 + $0x98] sm:$0xff]  ;;  %v3059_v53 = vld [vmem:[%s3345_s22 + $0x90] sm:$0xff] }
 0x3f9   : > { %v2283_v62 = vsel %vm4966_vm2, %v2246_v55, 0.0  ;;  %2024 = vst.msk [vmem:[%s4622_s26 + $0x40] sm:$0xff] %vm4967_vm14, %v1897_v6  ;;  %v2216_v16 = vsub.f32 %v1897_v6, %v3049_v0  ;;  %vm4981_vm2 = vmmov %vm4963_vm0 }
 0x3fa   : > { %v2284_v34 = vadd.f32 %v2283_v62, %v2282_v40  ;;  %v2249_v21 = vmul.f32 %v2217_v22, %v2217_v22  ;;  %vm4982_vm14 = vmmov %vm4963_vm0 }
 0x3fb   : > { %v2248_v45 = vmul.f32 %v2216_v16, %v2216_v16  ;;  %v2871_v5 = vpop.f32.mrb[10].mxu1  ;;  %vm4983_vm3 = vmmov %vm4963_vm0 }
 0x3fc   : > { %v2286_v50 = vadd.f32 %v2285_v44, %v2284_v34  ;;  %2027 = vst.msk [vmem:[%s4622_s26 + $0x58] sm:$0xff] %vm4969_vm4, %v2871_v5  ;;  %v2219_v52 = vsub.f32 %v2871_v5, %v3050_v29  ;;  %v1907_v25 = vpop.f32.mrb[11].mxu1  ;;  %v2289_v4 = vsel %vm4972_vm7, %v2249_v21, 0.0  ;;  %vm4984_vm4 = vmmov %vm4963_vm0  ;;  %v3060_v21 = vld [vmem:[%s3345_s22 + $0xa8] sm:$0xff]  ;;  %v3061_v29 = vld [vmem:[%s3345_s22 + $0xa0] sm:$0xff] }
 0x3fd   : > { %v2287_v18 = vsel %vm4970_vm5, %v2248_v45, 0.0  ;;  %2026 = vst.msk [vmem:[%s4622_s26 + $0x50] sm:$0xff] %vm4971_vm6, %v1907_v25  ;;  %v2218_v1 = vsub.f32 %v1907_v25, %v3051_v24  ;;  %vm4985_vm5 = vmmov %vm4963_vm0 }
 0x3fe   : > { %v2288_v14 = vadd.f32 %v2287_v18, %v2286_v50  ;;  %v2251_v8 = vmul.f32 %v2219_v52, %v2219_v52  ;;  %vm4986_vm6 = vmmov %vm4963_vm0 }
 0x3ff   : > { %v2250_v58 = vmul.f32 %v2218_v1, %v2218_v1  ;;  %v2874_v56 = vpop.f32.mrb[12].mxu1  ;;  %vm4987_vm7 = vmmov %vm4963_vm0 }
 0x400   : > { %v2290_v37 = vadd.f32 %v2289_v4, %v2288_v14  ;;  %2029 = vst.msk [vmem:[%s4622_s26 + $0x68] sm:$0xff] %vm4973_vm8, %v2874_v56  ;;  %v2221_v28 = vsub.f32 %v2874_v56, %v3052_v61  ;;  %v1917_v57 = vpop.f32.mrb[13].mxu1  ;;  %v2293_v26 = vsel %vm4976_vm11, %v2251_v8, 0.0  ;;  %vm4988_vm8 = vmmov %vm4963_vm0  ;;  %v3062_v8 = vld [vmem:[%s3345_s22 + $0xb8] sm:$0xff]  ;;  %v3063_v61 = vld [vmem:[%s3345_s22 + $0xb0] sm:$0xff] }
 0x401   : > { %v2291_v19 = vsel %vm4974_vm9, %v2250_v58, 0.0  ;;  %2028 = vst.msk [vmem:[%s4622_s26 + $0x60] sm:$0xff] %vm4975_vm10, %v1917_v57  ;;  %v2220_v32 = vsub.f32 %v1917_v57, %v3053_v39  ;;  %vm4989_vm9 = vmmov %vm4963_vm0 }
 0x402   : > { %v2292_v41 = vadd.f32 %v2291_v19, %v2290_v37  ;;  %v2253_v60 = vmul.f32 %v2221_v28, %v2221_v28  ;;  %vm4990_vm10 = vmmov %vm4963_vm0 }
 0x403   : > { %v2252_v27 = vmul.f32 %v2220_v32, %v2220_v32  ;;  %v2877_v54 = vpop.f32.mrb[14].mxu1  ;;  %vm4991_vm11 = vmmov %vm4963_vm0 }
 0x404   : > { %v2294_v36 = vadd.f32 %v2293_v26, %v2292_v41  ;;  %2031 = vst.msk [vmem:[%s4622_s26 + $0x78] sm:$0xff] %vm4977_vm12, %v2877_v54  ;;  %v2223_v20 = vsub.f32 %v2877_v54, %v3054_v35  ;;  %v1927_v43 = vpop.f32.mrb[15].mxu1  ;;  %v2297_v11 = vsel %vm4979_vm13, %v2253_v60, 0.0  ;;  %vm4992_vm12 = vmmov %vm4963_vm0  ;;  %v3064_v60 = vld [vmem:[%s3345_s22 + $0xc8] sm:$0xff]  ;;  %v3065_v35 = vld [vmem:[%s3345_s22 + $0xc0] sm:$0xff] }
 0x405   : > { %v2295_v51 = vsel %vm4978_vm15, %v2252_v27, 0.0  ;;  %2030 = vst.msk [vmem:[%s4622_s26 + $0x70] sm:$0xff] %vm4963_vm0, %v1927_v43  ;;  %v2222_v15 = vsub.f32 %v1927_v43, %v3055_v2  ;;  %vm4993_vm15 = vmmov %vm4963_vm0 }
 0x406   : > { %v2296_v9 = vadd.f32 %v2295_v51, %v2294_v36  ;;  %v2255_v59 = vmul.f32 %v2223_v20, %v2223_v20  ;;  %vm4994_vm13 = vmmov %vm4963_vm0 }
 0x407   : > { %v2254_v38 = vmul.f32 %v2222_v15, %v2222_v15  ;;  %v2880_v49 = vpop.f32.mrb[16].mxu1 }
 0x408   : > { %v2298_v12 = vadd.f32 %v2297_v11, %v2296_v9  ;;  %2033 = vst.msk [vmem:[%s4622_s26 + $0x88] sm:$0xff] %vm4980_vm1, %v2880_v49  ;;  %v2225_v23 = vsub.f32 %v2880_v49, %v3056_v17  ;;  %v1937_v63 = vpop.f32.mrb[17].mxu1  ;;  %v2301_v7 = vsel %vm4983_vm3, %v2255_v59, 0.0  ;;  %vm4995_vm1 = vmmov %vm4963_vm0  ;;  %v3066_v59 = vld [vmem:[%s3345_s22 + $0xd8] sm:$0xff]  ;;  %v3067_v17 = vld [vmem:[%s3345_s22 + $0xd0] sm:$0xff] }
 0x409   : > { %v2299_v48 = vsel %vm4981_vm2, %v2254_v38, 0.0  ;;  %2032 = vst.msk [vmem:[%s4622_s26 + $0x80] sm:$0xff] %vm4982_vm14, %v1937_v63  ;;  %v2224_v30 = vsub.f32 %v1937_v63, %v3057_v10  ;;  %vm4996_vm2 = vmmov %vm4963_vm0 }
 0x40a   : > { %v2300_v42 = vadd.f32 %v2299_v48, %v2298_v12  ;;  %v2257_v13 = vmul.f32 %v2225_v23, %v2225_v23  ;;  %vm4997_vm14 = vmmov %vm4963_vm0 }
 0x40b   : > { %v2256_v31 = vmul.f32 %v2224_v30, %v2224_v30  ;;  %v2883_v47 = vpop.f32.mrb[18].mxu1  ;;  %vm4998_vm3 = vmmov %vm4963_vm0 }
 0x40c   : > { %v2302_v46 = vadd.f32 %v2301_v7, %v2300_v42  ;;  %2035 = vst.msk [vmem:[%s4622_s26 + $0x98] sm:$0xff] %vm4984_vm4, %v2883_v47  ;;  %v2227_v55 = vsub.f32 %v2883_v47, %v3058_v3  ;;  %v1947_v33 = vpop.f32.mrb[19].mxu1  ;;  %v2305_v62 = vsel %vm4987_vm7, %v2257_v13, 0.0  ;;  %vm4999_vm4 = vmmov %vm4963_vm0  ;;  %v3068_v13 = vld [vmem:[%s3345_s22 + $0xe8] sm:$0xff]  ;;  %v3069_v3 = vld [vmem:[%s3345_s22 + $0xe0] sm:$0xff] }
 0x40d   : > { %v2303_v40 = vsel %vm4985_vm5, %v2256_v31, 0.0  ;;  %2034 = vst.msk [vmem:[%s4622_s26 + $0x90] sm:$0xff] %vm4986_vm6, %v1947_v33  ;;  %v2226_v22 = vsub.f32 %v1947_v33, %v3059_v53  ;;  %vm5000_vm5 = vmmov %vm4963_vm0 }
 0x40e   : > { %v2304_v6 = vadd.f32 %v2303_v40, %v2302_v46  ;;  %v2259_v0 = vmul.f32 %v2227_v55, %v2227_v55  ;;  %vm5001_vm6 = vmmov %vm4963_vm0 }
 0x40f   : > { %v2258_v16 = vmul.f32 %v2226_v22, %v2226_v22  ;;  %v2886_v34 = vpop.f32.mrb[20].mxu1  ;;  %vm5002_vm7 = vmmov %vm4963_vm0 }
 0x410   : > { %v2306_v44 = vadd.f32 %v2305_v62, %v2304_v6  ;;  %2037 = vst.msk [vmem:[%s4622_s26 + $0xa8] sm:$0xff] %vm4988_vm8, %v2886_v34  ;;  %v2229_v45 = vsub.f32 %v2886_v34, %v3060_v21  ;;  %v1957_v5 = vpop.f32.mrb[21].mxu1  ;;  %v2309_v18 = vsel %vm4991_vm11, %v2259_v0, 0.0  ;;  %vm5003_vm8 = vmmov %vm4963_vm0  ;;  %v3070_v0 = vld [vmem:[%s3345_s22 + $0xf8] sm:$0xff]  ;;  %v3071_v21 = vld [vmem:[%s3345_s22 + $0xf0] sm:$0xff] }
 0x411   : > { %v2307_v50 = vsel %vm4989_vm9, %v2258_v16, 0.0  ;;  %2036 = vst.msk [vmem:[%s4622_s26 + $0xa0] sm:$0xff] %vm4990_vm10, %v1957_v5  ;;  %v2228_v52 = vsub.f32 %v1957_v5, %v3061_v29  ;;  %vm5004_vm9 = vmmov %vm4963_vm0 }
 0x412   : > { %v2308_v25 = vadd.f32 %v2307_v50, %v2306_v44  ;;  %v2261_v24 = vmul.f32 %v2229_v45, %v2229_v45  ;;  %vm5005_vm10 = vmmov %vm4963_vm0 }
 0x413   : > { %v2260_v1 = vmul.f32 %v2228_v52, %v2228_v52  ;;  %v2889_v14 = vpop.f32.mrb[22].mxu1  ;;  %vm5006_vm11 = vmmov %vm4963_vm0 }
 0x414   : > { %v2310_v4 = vadd.f32 %v2309_v18, %v2308_v25  ;;  %2039 = vst.msk [vmem:[%s4622_s26 + $0xb8] sm:$0xff] %vm4992_vm12, %v2889_v14  ;;  %v2231_v58 = vsub.f32 %v2889_v14, %v3062_v8  ;;  %v1967_v56 = vpop.f32.mrb[23].mxu1  ;;  %v2313_v19 = vsel %vm4994_vm13, %v2261_v24, 0.0  ;;  %vm5007_vm12 = vmmov %vm4963_vm0 }
 0x415   : > { %v2311_v37 = vsel %vm4993_vm15, %v2260_v1, 0.0  ;;  %2038 = vst.msk [vmem:[%s4622_s26 + $0xb0] sm:$0xff] %vm4963_vm0, %v1967_v56  ;;  %v2230_v28 = vsub.f32 %v1967_v56, %v3063_v61  ;;  %vm5008_vm15 = vmmov %vm4963_vm0 }
 0x416   : > { %v2312_v57 = vadd.f32 %v2311_v37, %v2310_v4  ;;  %v2263_v39 = vmul.f32 %v2231_v58, %v2231_v58  ;;  %vm5009_vm13 = vmmov %vm4963_vm0 }
 0x417   : > { %v2262_v32 = vmul.f32 %v2230_v28, %v2230_v28  ;;  %v2892_v41 = vpop.f32.mrb[24].mxu1 }
 0x418   : > { %v2314_v26 = vadd.f32 %v2313_v19, %v2312_v57  ;;  %2041 = vst.msk [vmem:[%s4622_s26 + $0xc8] sm:$0xff] %vm4995_vm1, %v2892_v41  ;;  %v2233_v27 = vsub.f32 %v2892_v41, %v3064_v60  ;;  %v1977_v54 = vpop.f32.mrb[25].mxu1  ;;  %v2317_v51 = vsel %vm4998_vm3, %v2263_v39, 0.0  ;;  %vm5010_vm1 = vmmov %vm4963_vm0 }
 0x419   : > { %v2315_v36 = vsel %vm4996_vm2, %v2262_v32, 0.0  ;;  %2040 = vst.msk [vmem:[%s4622_s26 + $0xc0] sm:$0xff] %vm4997_vm14, %v1977_v54  ;;  %v2232_v20 = vsub.f32 %v1977_v54, %v3065_v35  ;;  %vm5011_vm2 = vmmov %vm4963_vm0 }
 0x41a   : > { %v2316_v43 = vadd.f32 %v2315_v36, %v2314_v26  ;;  %v2265_v2 = vmul.f32 %v2233_v27, %v2233_v27 }
 0x41b   : > { %v2264_v15 = vmul.f32 %v2232_v20, %v2232_v20  ;;  %v2895_v9 = vpop.f32.mrb[26].mxu1 }
 0x41c   : > { %v2318_v11 = vadd.f32 %v2317_v51, %v2316_v43  ;;  %2043 = vst.msk [vmem:[%s4622_s26 + $0xd8] sm:$0xff] %vm4999_vm4, %v2895_v9  ;;  %v2235_v38 = vsub.f32 %v2895_v9, %v3066_v59  ;;  %v1987_v49 = vpop.f32.mrb[27].mxu1  ;;  %v2321_v48 = vsel %vm5002_vm7, %v2265_v2, 0.0 }
 0x41d   : > { %v2319_v12 = vsel %vm5000_vm5, %v2264_v15, 0.0  ;;  %2042 = vst.msk [vmem:[%s4622_s26 + $0xd0] sm:$0xff] %vm5001_vm6, %v1987_v49  ;;  %v2234_v23 = vsub.f32 %v1987_v49, %v3067_v17 }
 0x41e   : > { %v2320_v63 = vadd.f32 %v2319_v12, %v2318_v11  ;;  %v2267_v10 = vmul.f32 %v2235_v38, %v2235_v38 }
 0x41f   : > { %v2266_v30 = vmul.f32 %v2234_v23, %v2234_v23  ;;  %v2898_v42 = vpop.f32.mrb[28].mxu1 }
 0x420   : > { %v2322_v7 = vadd.f32 %v2321_v48, %v2320_v63  ;;  %2045 = vst.msk [vmem:[%s4622_s26 + $0xe8] sm:$0xff] %vm5003_vm8, %v2898_v42  ;;  %v2237_v31 = vsub.f32 %v2898_v42, %v3068_v13  ;;  %v1997_v47 = vpop.f32.mrb[29].mxu1  ;;  %v2325_v40 = vsel %vm5006_vm11, %v2267_v10, 0.0 }
 0x421   : > { %v2323_v46 = vsel %vm5004_vm9, %v2266_v30, 0.0  ;;  %2044 = vst.msk [vmem:[%s4622_s26 + $0xe0] sm:$0xff] %vm5005_vm10, %v1997_v47  ;;  %v2236_v55 = vsub.f32 %v1997_v47, %v3069_v3 }
 0x422   : > { %v2324_v33 = vadd.f32 %v2323_v46, %v2322_v7  ;;  %v2269_v53 = vmul.f32 %v2237_v31, %v2237_v31 }
 0x423   : > { %v2268_v22 = vmul.f32 %v2236_v55, %v2236_v55  ;;  %v2901_v6 = vpop.f32.mrb[30].mxu1 }
 0x424   : > { %v2326_v62 = vadd.f32 %v2325_v40, %v2324_v33  ;;  %2047 = vst.msk [vmem:[%s4622_s26 + $0xf8] sm:$0xff] %vm5007_vm12, %v2901_v6  ;;  %v2239_v16 = vsub.f32 %v2901_v6, %v3070_v0  ;;  %v2007_v34 = vpop.f32.mrb[31].mxu1  ;;  %v2329_v50 = vsel %vm5009_vm13, %v2269_v53, 0.0 }
 0x425   : > { %v2327_v44 = vsel %vm5008_vm15, %v2268_v22, 0.0  ;;  %2046 = vst.msk [vmem:[%s4622_s26 + $0xf0] sm:$0xff] %vm4963_vm0, %v2007_v34  ;;  %v2238_v45 = vsub.f32 %v2007_v34, %v3071_v21 }
 0x426   : > { %v2328_v5 = vadd.f32 %v2327_v44, %v2326_v62  ;;  %v2271_v29 = vmul.f32 %v2239_v16, %v2239_v16 }
 0x427   : > { %v2270_v52 = vmul.f32 %v2238_v45, %v2238_v45 }
 0x428   : > { %v2330_v25 = vadd.f32 %v2329_v50, %v2328_v5  ;;  %v2333_v1 = vsel %vm5011_vm2, %v2271_v29, 0.0 }
 0x429   : > { %v2331_v18 = vsel %vm5010_vm1, %v2270_v52, 0.0 }
 0x42a   : > { %v2332_v24 = vadd.f32 %v2331_v18, %v2330_v25 }
 0x42c   : > { %v2334_v14 = vadd.f32 %v2333_v1, %v2332_v24 }
 0x42e   : > { %2335 = vadd.xlane.f32.xlu0 %v2334_v14 }
 0x42f   : > { %3115 = shalt.err (!%p3112_p2)
}
 0x430   : > { %s3116_s10 = scalar_lea.hbm %s4757_s5, 4096  ;;  %s3120_s23 = scalar_lea.hbm %s4835_s2, 8192 }
 0x431   : > { %p3117_p4 = scmp.ne.s32.totalorder %s4757_s5, %s3116_s10  ;;  %p3121_p9 = scmp.lt.u32.totalorder %s4757_s5, %s4835_s2 }
 0x432   : > { %p3122_p1 = scmp.lt.u32.totalorder %s3120_s23, %s3116_s10  ;;  %p3124_p6 = scmp.lt.u32.totalorder %s3116_s10, %s4757_s5 }
 0x433   : > { %p3118_p5 = pnand %p3117_p4, %p5012_p11 }
 0x434   : > { %p3123_p3 = por %p3122_p1, %p3121_p9 }
 0x435   : > { %p3119_p7 = pneg %p3118_p5 }
 0x436   : > { %p3125_p12 = por %p3124_p6, %p3123_p3 }
 0x438   : > { %p3126_p13 = pnand %p3125_p12, %p3119_p7 }
 0x43a   : > { %3129 = shalt.err (!%p3126_p13)
}
 0x43b   : > { %s3207_s30 = smov 128   ;;  %s3208_s22 = smov 8  }
 0x43c   : > { %2986 = dma.vmem_to_hbm [thread:$0]  (%p5012_p11), %s4759_s29, 4096, %s4757_s5, %s2347_s6, %s3207_s30, %s3207_s30, %s3208_s22  }
 0x43d   : > { %s2641_s7 = sshll.u32 %s3256_s19, 5  ;;  %s2385_s9 = sshll.u32 %s4617_s25, 4  ;;  %s2386_s9 = int_to_ptr.vmem [resolvable:$true] %s2385_s9 }
 0x43e   : > { %s4790_s10 = scalar_lea.hbm %s4836_s3, %s2641_s7  ;;  %s2352_s11 = scalar_lea.sflag [#allocation7], %s3339_s13 }
 0x43f   : > { %s3130_s12 = scalar_lea.vmem %s2386_s9, 32  ;;  %s3209_s23 = smov [#allocation6]  }
 0x440   : > { %p3131_p8 = scmp.ne.s32.totalorder %s2386_s9, %s3130_s12  ;;  %s3134_s26 = sshll.u32 %s3209_s23, 4  ;;  %s3135_s26 = int_to_ptr.vmem [resolvable:$false] %s3134_s26 }
 0x441   : > { %s3136_s14 = scalar_lea.vmem %s3135_s26, 64  ;;  %p3137_p2 = scmp.lt.s32.totalorder %s2386_s9, %s3135_s26 }
 0x442   : > { %p3132_p10 = pnand %p3131_p8, %p5012_p11  ;;  %p3138_p4 = scmp.lt.s32.totalorder %s3136_s14, %s3130_s12 }
 0x444   : > { %p3133_p0 = pneg %p3132_p10  ;;  %p3139_p5 = por %p3138_p4, %p3137_p2 }
 0x446   : > { %p3140_p7 = pnand %p3139_p5, %p3133_p0 }
 0x448   : > { %3143 = shalt.err (!%p3140_p7)
}
 0x449   : > { %s3144_s13 = scalar_lea.hbm %s4790_s10, 32  ;;  %s3148_s5 = scalar_lea.hbm %s4836_s3, 64 }
 0x44a   : > { %p3145_p9 = scmp.ne.s32.totalorder %s4790_s10, %s3144_s13  ;;  %p3149_p6 = scmp.lt.u32.totalorder %s4790_s10, %s4836_s3 }
 0x44b   : > { %p3150_p12 = scmp.lt.u32.totalorder %s3148_s5, %s3144_s13  ;;  %p3152_p8 = scmp.lt.u32.totalorder %s3144_s13, %s4790_s10 }
 0x44c   : > { %p3146_p1 = pnand %p3145_p9, %p5012_p11 }
 0x44d   : > { %p3151_p13 = por %p3150_p12, %p3149_p6 }
 0x44e   : > { %p3147_p3 = pneg %p3146_p1 }
 0x44f   : > { %p3153_p10 = por %p3152_p8, %p3151_p13 }
 0x451   : > { %p3154_p0 = pnand %p3153_p10, %p3147_p3 }
 0x453   : > { %3157 = shalt.err (!%p3154_p0)
}
 0x454   : > { %2987 = dma.vmem_to_hbm [thread:$0]  (%p5012_p11), %s2386_s9, 32, %s4790_s10, %s2352_s11  }
 0x455   : > { %p235_p2 = scmp.lt.s32.totalorder %s3256_s19, 1 }
 0x457   : > { %s5020_s19 = smov (!%p235_p2, %s3256_s19), 1 }
 0x458   : > { %s2524_s22 = sshll.u32 %s5020_s19, 3 }
 0x459   : > { %s238_s8 = scalar_lea.vmem %s4837_s4, %s2524_s22 }
 0x4bb   : > { %v2336_v4 = vpop.xlane.xlu0 %2335 }
 0x4bc   : > { %v2337_v8 = vrot.slane %v2336_v4, 4 }
 0x4be   : > { %v2338_v58 = vadd.f32 %v2337_v8, %v2336_v4 }
 0x4c0   : > { %v2339_v56 = vrot.slane %v2338_v58, 2 }
 0x4c2   : > { %v2340_v37 = vadd.f32 %v2339_v56, %v2338_v58 }
 0x4c4   : > { %v2341_v61 = vrot.slane %v2340_v37, 1 }
 0x4c6   : > { %v2342_v28 = vadd.f32 %v2341_v61, %v2340_v37 }
 0x4c8   : > { %2982 = vpush %v2342_v28 }
 0x4f9   : > { %s2983_s27 = spop %2982 }
 0x4fa   : > { %v2344_v57 = vstv %s2983_s27 }
 0x4fb   : > { %2345 = vst [vmem:[%s238_s8] sm:$0xff] %v2344_v57 }
 0x4fc PF: > { %s2400_s9 = sand.u32 1, %s3188_s15   ;;  %p5013_p11 = scmp.ne.s32.totalorder %s4889_s28, 0 }
 0x4fd   : > { %p5014_p4 = scmp.ge.s32.totalorder %s3200_s18, 2  ;;  %s2401_s10 = scalar_lea.sflag [#allocation4], %s2400_s9 }
 0x4ff   : > { %p2995_p5 = pnand %p5014_p4, %p5013_p11 }
 0x501   : > { %3179 = dma.done.wait (!%p2995_p5), %s2401_s10, 4096  }
 0x502   : > { %3181 = vsyncadd (!%p2995_p5), %s2401_s10, 4294963200  ;;  %s2410_s11 = scalar_lea.sflag [#allocation7], %s2400_s9 }
 0x503   : > { %3183 = dma.done.wait (!%p2995_p5), %s2410_s11, 32  }
 0x504   : > { %3185 = vsyncadd (!%p2995_p5), %s2410_s11, 4294967264  ;;  %p21_p7 = scmp.ge.s32.totalorder %s3260_s21, 4   ;;  %s5015_s15 = smov %s3192_s16 }
 0x505   : > { %s5016_s16 = smov %s3196_s17  ;;  %s5017_s17 = smov %s3272_s24 }
 0x506   : > { %s5018_s18 = smov %s3260_s21  ;;  %23 = sbr.rel (!%p21_p7) target bundleno = 7 (0x7), region = 102 }
 0x50d   :  { %2422 = vsyncpa [#allocation3], 1 }
 0x50e   :  { %2424 = vsyncpa [#allocation3 + $0x1], 1 }
 0x50f   :  { %2425 = vsyncpa [#allocation4], 1 }
 0x510   :  { %2427 = vsyncpa [#allocation4 + $0x1], 1 }
 0x511   :  { %2428 = vsyncpa [#allocation7], 1 }
 0x512   :  { %2430 = vsyncpa [#allocation7 + $0x1], 1 }

</bundles_post_ra>
